<compile_context>
chip_gen: v7x
topology: tpu7x:2x2x1
jax: 0.10.0
libtpu: 0.0.40
codegen_flags: <defaults>
</compile_context>

<pallas_src>
import functools

import jax
import jax.numpy as jnp
from jax.experimental import pallas as pl
from jax.experimental.pallas import tpu as pltpu


def _round_up(x, m):
    return ((x + m - 1) // m) * m


def _choose_tile_k(input_dim):
    # Keep w1 fully VMEM-resident for moderate input dims; K-tile for large
    # (bag-of-words style) vocabularies so w1 never exceeds VMEM (v7x: 64 MiB).
    return input_dim if input_dim <= 4096 else 2048


def _choose_tile_b(batch, tile_b):
    rb = _round_up(batch, 8)
    tb = min(tile_b, rb)
    # Guarantee >=2 batch tiles when the batch allows it, so the "parallel"
    # grid axis can actually be sharded across v7x's two TensorCores.
    if rb // tb < 2 and rb >= 16:
        tb = _round_up((rb + 1) // 2, 8)
    return tb


# ---------------------------------------------------------------------------
# Kernels
# ---------------------------------------------------------------------------

def _epilogue(h1, w2_ref, b2_ref, w3_ref, b3_ref, o_ref):
    """fc2 + ReLU + fc3 + softmax on an f32 h1 tile (bf16 MXU inputs)."""
    h2 = jnp.dot(h1.astype(jnp.bfloat16), w2_ref[...],
                 preferred_element_type=jnp.float32)
    h2 = jnp.maximum(h2 + b2_ref[...], 0.0)
    logits = jnp.dot(h2.astype(jnp.bfloat16), w3_ref[...],
                     preferred_element_type=jnp.float32) + b3_ref[...]
    # Numerically stable softmax over the 128-lane-padded class axis; the
    # padded classes carry a -1e30 bias so they never win the max and exp to 0.
    m = jnp.max(logits, axis=-1, keepdims=True)
    e = jnp.exp(logits - m)
    denom = jnp.sum(e, axis=-1, keepdims=True)
    # approx=True uses the EUP reciprocal; rows sum to 1 only to ~1e-3 rel.
    o_ref[...] = (e * pl.reciprocal(denom, approx=True)).astype(o_ref.dtype)


def _fused_kernel(x_ref, w1_ref, b1_ref, w2_ref, b2_ref, w3_ref, b3_ref, o_ref):
    # fc1 + ReLU: x cast to bf16 in VMEM; f32 accumulation on the MXU.
    h1 = jnp.dot(x_ref[...].astype(jnp.bfloat16), w1_ref[...],
                 preferred_element_type=jnp.float32)
    h1 = jnp.maximum(h1 + b1_ref[...], 0.0)
    _epilogue(h1, w2_ref, b2_ref, w3_ref, b3_ref, o_ref)


def _ktiled_kernel(x_ref, w1_ref, b1_ref, w2_ref, b2_ref, w3_ref, b3_ref,
                   o_ref, h1_acc):
    k = pl.program_id(1)

    @pl.when(k == 0)
    def _():
        h1_acc[...] = jnp.zeros_like(h1_acc)

    # Partial fc1 contraction over this K tile.
    h1_acc[...] += jnp.dot(x_ref[...].astype(jnp.bfloat16), w1_ref[...],
                           preferred_element_type=jnp.float32)

    @pl.when(k == pl.num_programs(1) - 1)
    def _():
        h1 = jnp.maximum(h1_acc[...] + b1_ref[...], 0.0)
        _epilogue(h1, w2_ref, b2_ref, w3_ref, b3_ref, o_ref)


# ---------------------------------------------------------------------------
# Parameter preparation (run ONCE at model setup, not per call)
# ---------------------------------------------------------------------------

def prepare_params(w1, b1, w2, b2, w3, b3):
    """bf16 cast, 128-lane class padding, and fc1 K-dim padding of the weights."""
    input_dim, hidden1 = w1.shape
    hidden2, num_classes = w3.shape

    tile_k = _choose_tile_k(input_dim)
    padded_k = _round_up(input_dim, tile_k)
    if padded_k != input_dim:
        w1 = jnp.zeros((padded_k, hidden1), w1.dtype).at[:input_dim].set(w1)

    padded_c = _round_up(max(num_classes, 128), 128)
    if padded_c != num_classes:
        w3 = jnp.zeros((hidden2, padded_c), w3.dtype).at[:, :num_classes].set(w3)
        # -1e30 pad bias: padded lanes never win the row max and exp to 0.
        b3 = jnp.full((1, padded_c), -1e30, jnp.float32).at[:, :num_classes].set(
            b3.reshape(1, num_classes))

    params = (
        w1.astype(jnp.bfloat16),
        b1.reshape(1, hidden1).astype(jnp.float32),
        w2.astype(jnp.bfloat16),
        b2.reshape(1, hidden2).astype(jnp.float32),
        w3.astype(jnp.bfloat16),
        b3.reshape(1, padded_c).astype(jnp.float32),
    )
    meta = dict(num_classes=num_classes, tile_k=tile_k)
    return params, meta


# ---------------------------------------------------------------------------
# Forward
# ---------------------------------------------------------------------------

@functools.partial(
    jax.jit, static_argnames=("num_classes", "tile_k", "tile_b", "out_dtype"))
def language_classifier_forward(x, w1, b1, w2, b2, w3, b3, *,
                                num_classes, tile_k, tile_b=512,
                                out_dtype=jnp.float32):
    batch, input_dim = x.shape
    padded_k, hidden1 = w1.shape
    hidden2 = w2.shape[1]
    padded_c = w3.shape[1]
    num_k = padded_k // tile_k

    tile_b = _choose_tile_b(batch, tile_b)
    padded_b = _round_up(batch, tile_b)

    # Pad x (batch rows / fc1 K) only when actually needed; x stays in its
    # input dtype and is cast to bf16 inside the kernel.
    if padded_b != batch or padded_k != input_dim:
        xp = jnp.zeros((padded_b, padded_k), x.dtype).at[:batch, :input_dim].set(x)
    else:
        xp = x

    num_b = padded_b // tile_b
    x_bytes = jnp.dtype(xp.dtype).itemsize
    out_bytes = jnp.dtype(out_dtype).itemsize

    def resident(shape, index_map):
        # Constant-index operands: single VMEM copy, never re-DMA'd.
        return pl.BlockSpec(shape, index_map, pipeline_mode=pl.Buffered(1))

    if num_k == 1:
        grid = (num_b,)
        const = lambda i: (0, 0)
        in_specs = [
            pl.BlockSpec((tile_b, padded_k), lambda i: (i, 0)),
            resident((padded_k, hidden1), const),
            resident((1, hidden1), const),
            resident((hidden1, hidden2), const),
            resident((1, hidden2), const),
            resident((hidden2, padded_c), const),
            resident((1, padded_c), const),
        ]
        out_specs = pl.BlockSpec((tile_b, padded_c), lambda i: (i, 0))
        kernel = _fused_kernel
        scratch_shapes = []
        dim_sem = ("parallel",)
        resident_w1 = padded_k * hidden1 * 2
        stream_bytes = 2 * tile_b * padded_k * x_bytes
    else:
        grid = (num_b, num_k)
        const = lambda i, k: (0, 0)
        in_specs = [
            pl.BlockSpec((tile_b, tile_k), lambda i, k: (i, k)),
            pl.BlockSpec((tile_k, hidden1), lambda i, k: (k, 0)),
            resident((1, hidden1), const),
            resident((hidden1, hidden2), const),
            resident((1, hidden2), const),
            resident((hidden2, padded_c), const),
            resident((1, padded_c), const),
        ]
        out_specs = pl.BlockSpec((tile_b, padded_c), lambda i, k: (i, 0))
        kernel = _ktiled_kernel
        scratch_shapes = [pltpu.VMEM((tile_b, hidden1), jnp.float32)]
        dim_sem = ("parallel", "arbitrary")
        resident_w1 = 0
        stream_bytes = 2 * tile_b * tile_k * x_bytes + 2 * tile_k * hidden1 * 2

    # ---- VMEM budget (generation-aware) -----------------------------------
    resident_bytes = (resident_w1 + hidden1 * hidden2 * 2
                      + hidden2 * padded_c * 2
                      + (hidden1 + hidden2 + padded_c) * 4)
    out_pipe = 2 * tile_b * padded_c * out_bytes
    scratch_bytes = tile_b * hidden1 * 4 if num_k > 1 else 0
    temp_bytes = tile_b * (hidden1 * 6 + hidden2 * 6 + padded_c * 6)
    needed = resident_bytes + stream_bytes + out_pipe + scratch_bytes + temp_bytes
    try:
        phys_vmem = int(pltpu.get_tpu_info().vmem_capacity_bytes)
    except Exception:
        phys_vmem = 64 * 1024 * 1024  # conservative (v7x per-TensorCore)
    vmem_limit = max(int(needed * 1.5) + (8 << 20), 32 << 20)
    vmem_limit = min(vmem_limit, phys_vmem - (2 << 20), 100 << 20)

    flops = 2 * padded_b * (padded_k * hidden1 + hidden1 * hidden2
                            + hidden2 * padded_c)
    bytes_accessed = (xp.size * x_bytes
                      + (padded_k * hidden1 + hidden1 * hidden2
                         + hidden2 * padded_c) * 2
                      + (hidden1 + hidden2 + padded_c) * 4
                      + padded_b * padded_c * out_bytes)

    out = pl.pallas_call(
        kernel,
        out_shape=jax.ShapeDtypeStruct((padded_b, padded_c), out_dtype),
        grid=grid,
        in_specs=in_specs,
        out_specs=out_specs,
        scratch_shapes=scratch_shapes,
        compiler_params=pltpu.CompilerParams(
            dimension_semantics=dim_sem,
            vmem_limit_bytes=int(vmem_limit),
        ),
        cost_estimate=pl.CostEstimate(
            flops=flops,
            transcendentals=padded_b * padded_c,
            bytes_accessed=bytes_accessed,
        ),
    )(xp, w1, b1, w2, b2, w3, b3)

    # Strip padding only when it was actually added (avoid gratuitous copies).
    if padded_b != batch:
        out = out[:batch]
    if padded_c != num_classes:
        out = out[:, :num_classes]
    return out


# ---------------------------------------------------------------------------
# Reference / test
# ---------------------------------------------------------------------------

def init_params(key, input_dim, num_classes):
    """Deterministic synthetic parameter init (Linear shapes from the module)."""
    ks = jax.random.split(key, 6)
    scale = 0.02
    w1 = scale * jax.random.normal(ks[0], (input_dim, 1024), jnp.float32)
    b1 = scale * jax.random.normal(ks[1], (1, 1024), jnp.float32)
    w2 = scale * jax.random.normal(ks[2], (1024, 512), jnp.float32)
    b2 = scale * jax.random.normal(ks[3], (1, 512), jnp.float32)
    w3 = scale * jax.random.normal(ks[4], (512, num_classes), jnp.float32)
    b3 = scale * jax.random.normal(ks[5], (1, num_classes), jnp.float32)
    return w1, b1, w2, b2, w3, b3


def reference_forward(x, w1, b1, w2, b2, w3, b3):
    h1 = jnp.maximum(x @ w1 + b1, 0.0)
    h2 = jnp.maximum(h1 @ w2 + b2, 0.0)
    logits = h2 @ w3 + b3
    return jax.nn.softmax(logits, axis=1)


if __name__ == "__main__":
    key = jax.random.PRNGKey(0)
    k_x, k_p = jax.random.split(key)

    batch, input_dim, num_classes = 8, 32, 16
    x = jax.random.normal(k_x, (batch, input_dim), jnp.float32)
    raw_params = init_params(k_p, input_dim, num_classes)

    # One-time parameter prep (bf16 cast + lane/K padding) at "model setup".
    params, meta = prepare_params(*raw_params)

    probs = language_classifier_forward(x, *params, **meta)
    probs = jax.block_until_ready(probs)

    ref = reference_forward(x, *raw_params)
    assert probs.shape == (batch, num_classes)
    # bf16 matmul inputs + approx reciprocal -> looser tolerance than pure f32.
    assert jnp.allclose(probs, ref, atol=2e-2, rtol=2e-2)
    assert jnp.allclose(jnp.sum(probs, axis=1), 1.0, atol=1e-2)

    print("KERNEL_OK")
</pallas_src>

<mosaic_0001>
module attributes {stable_mosaic.version = 11 : i64} {
  func.func @_fused_kernel(%arg0: i32, %arg1: memref<8x32xf32, #tpu.memory_space<vmem>>, %arg2: memref<32x1024xbf16, #tpu.memory_space<vmem>>, %arg3: memref<1x1024xf32, #tpu.memory_space<vmem>>, %arg4: memref<1024x512xbf16, #tpu.memory_space<vmem>>, %arg5: memref<1x512xf32, #tpu.memory_space<vmem>>, %arg6: memref<512x128xbf16, #tpu.memory_space<vmem>>, %arg7: memref<1x128xf32, #tpu.memory_space<vmem>>, %arg8: memref<8x128xf32, #tpu.memory_space<vmem>>) attributes {dimension_semantics = [#tpu.dimension_semantics<parallel>], iteration_bounds = array<i64: 1>, scalar_prefetch = 0 : i64, scratch_operands = 0 : i64, tpu.core_type = #tpu.core_type<tc>, window_params = [{transform_indices = @transform_0, window_bounds = array<i64: 8, 32>}, {pipeline_mode = #tpu.pipeline_mode<synchronous>, transform_indices = @transform_1, window_bounds = array<i64: 32, 1024>}, {pipeline_mode = #tpu.pipeline_mode<synchronous>, transform_indices = @transform_2, window_bounds = array<i64: 1, 1024>}, {pipeline_mode = #tpu.pipeline_mode<synchronous>, transform_indices = @transform_3, window_bounds = array<i64: 1024, 512>}, {pipeline_mode = #tpu.pipeline_mode<synchronous>, transform_indices = @transform_4, window_bounds = array<i64: 1, 512>}, {pipeline_mode = #tpu.pipeline_mode<synchronous>, transform_indices = @transform_5, window_bounds = array<i64: 512, 128>}, {pipeline_mode = #tpu.pipeline_mode<synchronous>, transform_indices = @transform_6, window_bounds = array<i64: 1, 128>}, {transform_indices = @transform_7, window_bounds = array<i64: 8, 128>}]} {
    %c0 = arith.constant 0 : index
    %c0_0 = arith.constant 0 : index
    %0 = vector.load %arg1[%c0, %c0_0] : memref<8x32xf32, #tpu.memory_space<vmem>>, vector<8x32xf32>
    %1 = arith.truncf %0 : vector<8x32xf32> to vector<8x32xbf16>
    %c0_1 = arith.constant 0 : index
    %c0_2 = arith.constant 0 : index
    %2 = vector.load %arg2[%c0_1, %c0_2] : memref<32x1024xbf16, #tpu.memory_space<vmem>>, vector<32x1024xbf16>
    %cst = arith.constant dense<0.000000e+00> : vector<8x1024xf32>
    %3 = tpu.matmul %1, %2, %cst {dimension_numbers = #tpu.dot_dimension_numbers<[1], [0], [0], [1], [0, 0, 1, 1], [], []>} : vector<8x32xbf16>, vector<32x1024xbf16>, vector<8x1024xf32> -> vector<8x1024xf32>
    %c0_3 = arith.constant 0 : index
    %c0_4 = arith.constant 0 : index
    %4 = vector.load %arg3[%c0_3, %c0_4] : memref<1x1024xf32, #tpu.memory_space<vmem>>, vector<1x1024xf32>
    %5 = vector.broadcast %4 : vector<1x1024xf32> to vector<8x1024xf32>
    %6 = arith.addf %3, %5 : vector<8x1024xf32>
    %cst_5 = arith.constant 0.000000e+00 : f32
    %7 = vector.broadcast %cst_5 : f32 to vector<8x1024xf32>
    %8 = arith.maximumf %6, %7 : vector<8x1024xf32>
    %9 = arith.truncf %8 : vector<8x1024xf32> to vector<8x1024xbf16>
    %c0_6 = arith.constant 0 : index
    %c0_7 = arith.constant 0 : index
    %10 = vector.load %arg4[%c0_6, %c0_7] : memref<1024x512xbf16, #tpu.memory_space<vmem>>, vector<1024x512xbf16>
    %cst_8 = arith.constant dense<0.000000e+00> : vector<8x512xf32>
    %11 = tpu.matmul %9, %10, %cst_8 {dimension_numbers = #tpu.dot_dimension_numbers<[1], [0], [0], [1], [0, 0, 1, 1], [], []>} : vector<8x1024xbf16>, vector<1024x512xbf16>, vector<8x512xf32> -> vector<8x512xf32>
    %c0_9 = arith.constant 0 : index
    %c0_10 = arith.constant 0 : index
    %12 = vector.load %arg5[%c0_9, %c0_10] : memref<1x512xf32, #tpu.memory_space<vmem>>, vector<1x512xf32>
    %13 = vector.broadcast %12 : vector<1x512xf32> to vector<8x512xf32>
    %14 = arith.addf %11, %13 : vector<8x512xf32>
    %cst_11 = arith.constant 0.000000e+00 : f32
    %15 = vector.broadcast %cst_11 : f32 to vector<8x512xf32>
    %16 = arith.maximumf %14, %15 : vector<8x512xf32>
    %17 = arith.truncf %16 : vector<8x512xf32> to vector<8x512xbf16>
    %c0_12 = arith.constant 0 : index
    %c0_13 = arith.constant 0 : index
    %18 = vector.load %arg6[%c0_12, %c0_13] : memref<512x128xbf16, #tpu.memory_space<vmem>>, vector<512x128xbf16>
    %cst_14 = arith.constant dense<0.000000e+00> : vector<8x128xf32>
    %19 = tpu.matmul %17, %18, %cst_14 {dimension_numbers = #tpu.dot_dimension_numbers<[1], [0], [0], [1], [0, 0, 1, 1], [], []>} : vector<8x512xbf16>, vector<512x128xbf16>, vector<8x128xf32> -> vector<8x128xf32>
    %c0_15 = arith.constant 0 : index
    %c0_16 = arith.constant 0 : index
    %20 = vector.load %arg7[%c0_15, %c0_16] : memref<1x128xf32, #tpu.memory_space<vmem>>, vector<1x128xf32>
    %21 = vector.broadcast %20 : vector<1x128xf32> to vector<8x128xf32>
    %22 = arith.addf %19, %21 : vector<8x128xf32>
    %cst_17 = arith.constant dense<0xFF800000> : vector<8xf32>
    %23 = vector.multi_reduction <maximumf>, %22, %cst_17 [1] : vector<8x128xf32> to vector<8xf32>
    %24 = vector.shape_cast %23 : vector<8xf32> to vector<8x1xf32>
    %25 = vector.broadcast %24 : vector<8x1xf32> to vector<8x128xf32>
    %26 = arith.subf %22, %25 : vector<8x128xf32>
    %27 = math.exp %26 : vector<8x128xf32>
    %cst_18 = arith.constant dense<0.000000e+00> : vector<8xf32>
    %28 = vector.multi_reduction <add>, %27, %cst_18 [1] : vector<8x128xf32> to vector<8xf32>
    %29 = vector.shape_cast %28 : vector<8xf32> to vector<8x1xf32>
    %30 = tpu.reciprocal %29 {approx = true} : vector<8x1xf32> -> vector<8x1xf32>
    %31 = vector.broadcast %30 : vector<8x1xf32> to vector<8x128xf32>
    %32 = arith.mulf %27, %31 : vector<8x128xf32>
    %c0_19 = arith.constant 0 : index
    %c0_20 = arith.constant 0 : index
    %33 = vector.load %arg8[%c0_19, %c0_20] : memref<8x128xf32, #tpu.memory_space<vmem>>, vector<8x128xf32>
    tpu.vector_store %arg8[%c0_19, %c0_20], %32 {strides = array<i32>} : memref<8x128xf32, #tpu.memory_space<vmem>>, vector<8x128xf32>,
    return
  }
  func.func @transform_0(%arg0: i32) -> (i32, i32) {
    %c0_i32 = arith.constant 0 : i32
    %c0_i32_0 = arith.constant 0 : i32
    return %arg0, %c0_i32 : i32, i32
  }
  func.func @transform_1(%arg0: i32) -> (i32, i32) {
    %c0_i32 = arith.constant 0 : i32
    %c0_i32_0 = arith.constant 0 : i32
    %c0_i32_1 = arith.constant 0 : i32
    return %c0_i32, %c0_i32_0 : i32, i32
  }
  func.func @transform_2(%arg0: i32) -> (i32, i32) {
    %c0_i32 = arith.constant 0 : i32
    %c0_i32_0 = arith.constant 0 : i32
    %c0_i32_1 = arith.constant 0 : i32
    return %c0_i32, %c0_i32_0 : i32, i32
  }
  func.func @transform_3(%arg0: i32) -> (i32, i32) {
    %c0_i32 = arith.constant 0 : i32
    %c0_i32_0 = arith.constant 0 : i32
    %c0_i32_1 = arith.constant 0 : i32
    return %c0_i32, %c0_i32_0 : i32, i32
  }
  func.func @transform_4(%arg0: i32) -> (i32, i32) {
    %c0_i32 = arith.constant 0 : i32
    %c0_i32_0 = arith.constant 0 : i32
    %c0_i32_1 = arith.constant 0 : i32
    return %c0_i32, %c0_i32_0 : i32, i32
  }
  func.func @transform_5(%arg0: i32) -> (i32, i32) {
    %c0_i32 = arith.constant 0 : i32
    %c0_i32_0 = arith.constant 0 : i32
    %c0_i32_1 = arith.constant 0 : i32
    return %c0_i32, %c0_i32_0 : i32, i32
  }
  func.func @transform_6(%arg0: i32) -> (i32, i32) {
    %c0_i32 = arith.constant 0 : i32
    %c0_i32_0 = arith.constant 0 : i32
    %c0_i32_1 = arith.constant 0 : i32
    return %c0_i32, %c0_i32_0 : i32, i32
  }
  func.func @transform_7(%arg0: i32) -> (i32, i32) {
    %c0_i32 = arith.constant 0 : i32
    %c0_i32_0 = arith.constant 0 : i32
    return %arg0, %c0_i32 : i32, i32
  }
}

</mosaic_0001>

<bundles_post_ra>
// kernel: language_classifier_forward.1
= control target key start
LH: loop header
LB: loop body
LE: loop exit
PB: predicated region body
PF: predicated region fallthrough
CT: control target
= control target key end

     0   :  { %12 = vsyncpa [#allocation3], 0  ;;  %s3820_s0 = inlined_call_operand.hbm [shape: f32[8,32], index: 0, kind: input, shape index: {}]   ;;  %s3821_s1 = inlined_call_operand.hbm [shape: bf16[32,1024], index: 1, kind: input, shape index: {}]   ;;  %s3822_s2 = inlined_call_operand.hbm [shape: f32[1,1024], index: 2, kind: input, shape index: {}]   ;;  %s3823_s3 = inlined_call_operand.hbm [shape: bf16[1024,512], index: 3, kind: input, shape index: {}]   ;;  %s3824_s4 = inlined_call_operand.vmem [shape: f32[1,512], index: 4, kind: input, shape index: {}]   ;;  %s3825_s5 = inlined_call_operand.hbm [shape: bf16[512,128], index: 5, kind: input, shape index: {}]   ;;  %s3826_s6 = inlined_call_operand.vmem [shape: f32[1,128], index: 6, kind: input, shape index: {}]   ;;  %s3827_s7 = inlined_call_operand.hbm [shape: f32[8,128], index: 7, kind: output, shape index: {}]  }
   0x1   :  { %13 = vsyncpa [#allocation6], 0 }
   0x2   :  { %14 = vsyncpa [#allocation9], 0 }
   0x3   :  { %15 = vsyncpa [#allocation4], 0  ;;  %s3634_s24 = smov [#allocation5]   ;;  %s3494_s28 = scalar_lea.hbm %s3821_s1, 2048 }
   0x4   :  { %s31_s25 = sshll.u32 %s3634_s24, 4  ;;  %p3495_p0 = scmp.ne.s32.totalorder %s3821_s1, %s3494_s28  ;;  %s32_s25 = int_to_ptr.vmem [resolvable:$true] %s31_s25 }
   0x5   :  { %p3498_p1 = scmp.lt.u32.totalorder %s3494_s28, %s3821_s1 }
   0x7   :  { %p3500_p2 = pnand %p3498_p1, %p3495_p0 }
   0x9   :  { %3503 = shalt.err (!%p3500_p2)
}
   0xa   :  { %s3504_s10 = scalar_lea.vmem %s32_s25, 2048  ;;  %p3509_p4 = scmp.lt.s32.totalorder %s32_s25, %s32_s25 }
   0xb   :  { %p3505_p3 = scmp.ne.s32.totalorder %s32_s25, %s3504_s10  ;;  %p3510_p5 = scmp.lt.s32.totalorder %s3504_s10, %s3504_s10 }
   0xd   :  { %p3511_p6 = por %p3510_p5, %p3509_p4 }
   0xf   :  { %p3512_p7 = pnand %p3511_p6, %p3505_p3 }
  0x11   :  { %3515 = shalt.err (!%p3512_p7)
}
  0x12   :  { %s3635_s11 = smov 512   ;;  %s3636_s12 = smov 32  }
  0x13   :  { %37 = dma.hbm_to_vmem [thread:$0]  %s3821_s1, 2048, %s32_s25, [#allocation6], %s3635_s11, %s3635_s11, %s3636_s12  }
  0x14   :  { %s3637_s15 = smov [#allocation8]   ;;  %s3516_s19 = scalar_lea.hbm %s3823_s3, 32768 }
  0x15   :  { %s53_s16 = sshll.u32 %s3637_s15, 4  ;;  %p3517_p8 = scmp.ne.s32.totalorder %s3823_s3, %s3516_s19  ;;  %s54_s16 = int_to_ptr.vmem [resolvable:$true] %s53_s16 }
  0x16   :  { %p3520_p9 = scmp.lt.u32.totalorder %s3516_s19, %s3823_s3 }
  0x18   :  { %p3522_p10 = pnand %p3520_p9, %p3517_p8 }
  0x1a   :  { %3525 = shalt.err (!%p3522_p10)
}
  0x1b   :  { %s3526_s24 = scalar_lea.vmem %s54_s16, 32768  ;;  %p3531_p12 = scmp.lt.s32.totalorder %s54_s16, %s54_s16 }
  0x1c   :  { %p3527_p11 = scmp.ne.s32.totalorder %s54_s16, %s3526_s24  ;;  %p3532_p13 = scmp.lt.s32.totalorder %s3526_s24, %s3526_s24 }
  0x1e   :  { %p3533_p0 = por %p3532_p13, %p3531_p12 }
  0x20   :  { %p3534_p1 = pnand %p3533_p0, %p3527_p11 }
  0x22   :  { %3537 = shalt.err (!%p3534_p1)
}
  0x23   :  { %s3638_s1 = smov 256   ;;  %s3639_s25 = smov 16  }
  0x24   :  { %59 = dma.hbm_to_vmem [thread:$0]  %s3823_s3, 32768, %s54_s16, [#allocation9], %s3638_s1, %s3638_s1, %s3639_s25  }
  0x25   :  { %s3640_s28 = smov [#allocation2]   ;;  %s3641_s30 = smov [#allocation7]  }
  0x26   :  { %s22_s29 = sshll.u32 %s3640_s28, 4  ;;  %s44_s8 = sshll.u32 %s3641_s30, 4  ;;  %s23_s29 = int_to_ptr.vmem [resolvable:$true] %s22_s29  ;;  %s45_s8 = int_to_ptr.vmem [resolvable:$true] %s44_s8 }
  0x27   :  { %s3538_s11 = scalar_lea.hbm %s3820_s0, 128 }
  0x28   :  { %p3539_p2 = scmp.ne.s32.totalorder %s3820_s0, %s3538_s11  ;;  %p3542_p3 = scmp.lt.u32.totalorder %s3538_s11, %s3820_s0 }
  0x2a   :  { %p3544_p4 = pnand %p3542_p3, %p3539_p2 }
  0x2c   :  { %3547 = shalt.err (!%p3544_p4)
}
  0x2d   :  { %s3548_s3 = scalar_lea.vmem %s23_s29, 128  ;;  %p3553_p6 = scmp.lt.s32.totalorder %s23_s29, %s23_s29 }
  0x2e   :  { %p3549_p5 = scmp.ne.s32.totalorder %s23_s29, %s3548_s3  ;;  %p3554_p7 = scmp.lt.s32.totalorder %s3548_s3, %s3548_s3 }
  0x30   :  { %p3555_p8 = por %p3554_p7, %p3553_p6 }
  0x32   :  { %p3556_p9 = pnand %p3555_p8, %p3549_p5 }
  0x34   :  { %3559 = shalt.err (!%p3556_p9)
}
  0x35   :  { %25 = dma.hbm_to_vmem [thread:$0]  %s3820_s0, 128, %s23_s29, [#allocation3]  }
  0x36   :  { %s3560_s20 = scalar_lea.hbm %s3822_s2, 128 }
  0x37   :  { %p3561_p10 = scmp.ne.s32.totalorder %s3822_s2, %s3560_s20  ;;  %p3564_p11 = scmp.lt.u32.totalorder %s3560_s20, %s3822_s2 }
  0x39   :  { %p3566_p12 = pnand %p3564_p11, %p3561_p10 }
  0x3b   :  { %3569 = shalt.err (!%p3566_p12)
}
  0x3c   :  { %s3570_s1 = scalar_lea.vmem %s45_s8, 128  ;;  %p3575_p0 = scmp.lt.s32.totalorder %s45_s8, %s45_s8 }
  0x3d   :  { %p3571_p13 = scmp.ne.s32.totalorder %s45_s8, %s3570_s1  ;;  %p3576_p1 = scmp.lt.s32.totalorder %s3570_s1, %s3570_s1 }
  0x3f   :  { %p3577_p2 = por %p3576_p1, %p3575_p0 }
  0x41   :  { %p3578_p3 = pnand %p3577_p2, %p3571_p13 }
  0x43   :  { %3581 = shalt.err (!%p3578_p3)
}
  0x44   :  { %47 = dma.hbm_to_vmem [thread:$0]  %s3822_s2, 128, %s45_s8, [#allocation6]  }
  0x45   :  { %s3642_s26 = smov [#allocation10]   ;;  %s3582_s30 = scalar_lea.hbm %s3825_s5, 4096 }
  0x46   :  { %s67_s27 = sshll.u32 %s3642_s26, 4  ;;  %p3583_p4 = scmp.ne.s32.totalorder %s3825_s5, %s3582_s30  ;;  %s68_s27 = int_to_ptr.vmem [resolvable:$true] %s67_s27 }
  0x47   :  { %p3586_p5 = scmp.lt.u32.totalorder %s3582_s30, %s3825_s5 }
  0x49   :  { %p3588_p6 = pnand %p3586_p5, %p3583_p4 }
  0x4b   :  { %3591 = shalt.err (!%p3588_p6)
}
  0x4c   :  { %s3592_s13 = scalar_lea.vmem %s68_s27, 4096  ;;  %p3597_p8 = scmp.lt.s32.totalorder %s68_s27, %s68_s27 }
  0x4d   :  { %p3593_p7 = scmp.ne.s32.totalorder %s68_s27, %s3592_s13  ;;  %p3598_p9 = scmp.lt.s32.totalorder %s3592_s13, %s3592_s13 }
  0x4f   :  { %p3599_p10 = por %p3598_p9, %p3597_p8 }
  0x51   :  { %p3600_p11 = pnand %p3599_p10, %p3593_p7 }
  0x53   :  { %3603 = shalt.err (!%p3600_p11)
}
  0x54   :  { %s3643_s2 = smov 64   ;;  %s3644_s8 = smov 4  }
  0x55   :  { %73 = dma.hbm_to_vmem [thread:$0]  %s3825_s5, 4096, %s68_s27, [#allocation9], %s3643_s2, %s3643_s2, %s3644_s8  }
  0x56   :  { %3626 = dma.done.wait [#allocation3], 128  }
  0x57   :  { %3627 = vsyncadd [#allocation3], 4294967168 }
  0x58   :  { %3628 = dma.done.wait [#allocation6], 2176  }
  0x59   :  { %3629 = vsyncadd [#allocation6], 4294965120 }
  0x5a   :  { %3630 = dma.done.wait [#allocation9], 36864  }
  0x5b   :  { %3631 = vsyncadd [#allocation9], 4294930432  ;;  %v3645_v0 = vmov 0   ;;  %v94_v1 = vld [vmem:[#allocation5] sm:$0xff]  ;;  %v95_v7 = vld [vmem:[#allocation5 + $0x8] sm:$0xff]  ;;  %vm232_vm0 = vcmask 261120  }
  0x5c   :  { %268 = vmatprep.mubr.bf16.mxu0 %v3645_v0  ;;  %309 = vmatprep.mubr.bf16.mxu1 %v3645_v0  ;;  %v98_v2 = vld [vmem:[#allocation5 + $0x20] sm:$0xff]  ;;  %v99_v9 = vld [vmem:[#allocation5 + $0x28] sm:$0xff]  ;;  %v96_v15 = vld [vmem:[#allocation5 + $0x10] sm:$0xff] }
  0x5d   :  { %v102_v3 = vld [vmem:[#allocation5 + $0x40] sm:$0xff]  ;;  %v2681_v4 = vcombine.high %v94_v1, %v98_v2  ;;  %v2680_v5 = vcombine.low %v94_v1, %v98_v2  ;;  %v103_v10 = vld [vmem:[#allocation5 + $0x48] sm:$0xff]  ;;  %v2683_v12 = vcombine.high %v95_v7, %v99_v9  ;;  %v2682_v13 = vcombine.low %v95_v7, %v99_v9  ;;  %v100_v16 = vld [vmem:[#allocation5 + $0x30] sm:$0xff] }
  0x5e   :  { %v106_v6 = vld [vmem:[#allocation5 + $0x60] sm:$0xff]  ;;  %v107_v11 = vld [vmem:[#allocation5 + $0x68] sm:$0xff]  ;;  %v92_v18 = vld [vmem:[#allocation2] sm:$0xff]  ;;  %v2685_v21 = vcombine.high %v96_v15, %v100_v16  ;;  %v2684_v28 = vcombine.low %v96_v15, %v100_v16 }
  0x5f   :  { %v2689_v8 = vcombine.high %v102_v3, %v106_v6  ;;  %236 = vmatprep.subr.bf16.mxu0 %v2681_v4  ;;  %v2691_v14 = vcombine.high %v103_v10, %v107_v11  ;;  %v2688_v17 = vcombine.low %v102_v3, %v106_v6  ;;  %v97_v19 = vld [vmem:[#allocation5 + $0x18] sm:$0xff]  ;;  %277 = vmatprep.subr.bf16.mxu1 %v2683_v12  ;;  %v104_v23 = vld [vmem:[#allocation5 + $0x50] sm:$0xff] }
  0x60   :  { %237 = vmatpush1.bf16.msra.mxu0 %v2680_v5  ;;  %v101_v20 = vld [vmem:[#allocation5 + $0x38] sm:$0xff]  ;;  %278 = vmatpush1.bf16.msra.mxu1 %v2682_v13  ;;  %v2690_v22 = vcombine.low %v103_v10, %v107_v11  ;;  %v108_v24 = vld [vmem:[#allocation5 + $0x70] sm:$0xff]  ;;  %v93_v25 = vpack.c.bf16 %v92_v18, %v92_v18 }
  0x61   :  { %238 = vmatprep.subr.bf16.mxu0 %v2689_v8  ;;  %279 = vmatprep.subr.bf16.mxu1 %v2691_v14  ;;  %v2687_v26 = vcombine.high %v97_v19, %v101_v20  ;;  %v105_v27 = vld [vmem:[#allocation5 + $0x58] sm:$0xff]  ;;  %v2693_v30 = vcombine.high %v104_v23, %v108_v24  ;;  %v2686_v31 = vcombine.low %v97_v19, %v101_v20  ;;  %v3079_v36 = vld [vmem:[#allocation8 + $0xc] ss:$16 sps:$4 sm:$0xff]   ;;  %v3077_v39 = vld [vmem:[#allocation8 + $0x8] ss:$16 sps:$4 sm:$0xff]  }
  0x62   :  { %v109_v29 = vld [vmem:[#allocation5 + $0x78] sm:$0xff]  ;;  %v2692_v33 = vcombine.low %v104_v23, %v108_v24  ;;  %v3085_v40 = vld [vmem:[#allocation8 + $0x2c] ss:$16 sps:$4 sm:$0xff]   ;;  %v3083_v43 = vld [vmem:[#allocation8 + $0x28] ss:$16 sps:$4 sm:$0xff]  }
  0x63   :  { %v2695_v32 = vcombine.high %v105_v27, %v109_v29  ;;  %v3076_v34 = vld [vmem:[#allocation8 + $0x4] ss:$16 sps:$4 sm:$0xff]   ;;  %v2694_v35 = vcombine.low %v105_v27, %v109_v29  ;;  %v3074_v37 = vld [vmem:[#allocation8] ss:$16 sps:$4 sm:$0xff]   ;;  %v3091_v44 = vld [vmem:[#allocation8 + $0x4c] ss:$16 sps:$4 sm:$0xff]  }
  0x64   :  { %239 = vmatpush1.bf16.msra.mxu0 %v2688_v17  ;;  %280 = vmatpush1.bf16.msra.mxu1 %v2690_v22  ;;  %v3082_v38 = vld [vmem:[#allocation8 + $0x24] ss:$16 sps:$4 sm:$0xff]   ;;  %v3080_v41 = vld [vmem:[#allocation8 + $0x20] ss:$16 sps:$4 sm:$0xff]   ;;  %v3089_v47 = vld [vmem:[#allocation8 + $0x48] ss:$16 sps:$4 sm:$0xff]  }
  0x65   :  { %318 = vmatprep.subr.bf16.mxu0 %v2685_v21  ;;  %359 = vmatprep.subr.bf16.mxu1 %v2687_v26  ;;  %v3088_v42 = vld [vmem:[#allocation8 + $0x44] ss:$16 sps:$4 sm:$0xff]   ;;  %v3086_v45 = vld [vmem:[#allocation8 + $0x40] ss:$16 sps:$4 sm:$0xff]   ;;  %v3097_v48 = vld [vmem:[#allocation8 + $0x6c] ss:$16 sps:$4 sm:$0xff]  }
  0x66   :  { %v3094_v46 = vld [vmem:[#allocation8 + $0x64] ss:$16 sps:$4 sm:$0xff]   ;;  %v3092_v49 = vld [vmem:[#allocation8 + $0x60] ss:$16 sps:$4 sm:$0xff]   ;;  %v3095_v51 = vld [vmem:[#allocation8 + $0x68] ss:$16 sps:$4 sm:$0xff]  }
  0x67   :  { %2696 = vmatmul.mubr.msk.bf16.vlgmr.msra.gmra.mrb[0].mxu0 %vm232_vm0, %v93_v25  ;;  %2697 = vmatmul.mubr.msk.bf16.vlgmr.msra.gmra.mrb[0].mxu1 %vm232_vm0, %v93_v25  ;;  %v3100_v50 = vld [vmem:[#allocation8 + $0x84] ss:$16 sps:$4 sm:$0xff]   ;;  %v3103_v52 = vld [vmem:[#allocation8 + $0x8c] ss:$16 sps:$4 sm:$0xff]   ;;  %v3098_v53 = vld [vmem:[#allocation8 + $0x80] ss:$16 sps:$4 sm:$0xff]  }
  0x68   :  { %319 = vmatpush1.bf16.msra.mxu0 %v2684_v28  ;;  %350 = vmatprep.mubr.bf16.mxu0 %v3645_v0  ;;  %v3106_v54 = vld [vmem:[#allocation8 + $0xa4] ss:$16 sps:$4 sm:$0xff]   ;;  %v3101_v55 = vld [vmem:[#allocation8 + $0x88] ss:$16 sps:$4 sm:$0xff]   ;;  %v3109_v56 = vld [vmem:[#allocation8 + $0xac] ss:$16 sps:$4 sm:$0xff]  }
  0x69   :  { %320 = vmatprep.subr.bf16.mxu0 %v2693_v30  ;;  %360 = vmatpush1.bf16.msra.mxu1 %v2686_v31  ;;  %v3104_v57 = vld [vmem:[#allocation8 + $0xa0] ss:$16 sps:$4 sm:$0xff]   ;;  %v3112_v58 = vld [vmem:[#allocation8 + $0xc4] ss:$16 sps:$4 sm:$0xff]   ;;  %v3107_v59 = vld [vmem:[#allocation8 + $0xa8] ss:$16 sps:$4 sm:$0xff]  }
  0x6a   :  { %391 = vmatprep.mubr.bf16.mxu1 %v3645_v0  ;;  %361 = vmatprep.subr.bf16.mxu1 %v2695_v32  ;;  %v3115_v60 = vld [vmem:[#allocation8 + $0xcc] ss:$16 sps:$4 sm:$0xff]   ;;  %v3110_v61 = vld [vmem:[#allocation8 + $0xc0] ss:$16 sps:$4 sm:$0xff]   ;;  %v3113_v62 = vld [vmem:[#allocation8 + $0xc8] ss:$16 sps:$4 sm:$0xff]  }
  0x6b   :  { %v3118_v63 = vld [vmem:[#allocation8 + $0xe4] ss:$16 sps:$4 sm:$0xff]   ;;  %v3116_v0 = vld [vmem:[#allocation8 + $0xe0] ss:$16 sps:$4 sm:$0xff]   ;;  %v3121_v1 = vld [vmem:[#allocation8 + $0xec] ss:$16 sps:$4 sm:$0xff]  }
  0x6c   :  { %321 = vmatpush1.bf16.msra.mxu0 %v2692_v33  ;;  %v3124_v2 = vld [vmem:[#allocation8 + $0x104] ss:$16 sps:$4 sm:$0xff]   ;;  %v3119_v3 = vld [vmem:[#allocation8 + $0xe8] ss:$16 sps:$4 sm:$0xff]   ;;  %v3127_v4 = vld [vmem:[#allocation8 + $0x10c] ss:$16 sps:$4 sm:$0xff]  }
  0x6d   :  { %1974 = vmatprep.subr.bf16.mxu0 %v3076_v34  ;;  %362 = vmatpush1.bf16.msra.mxu1 %v2694_v35  ;;  %v3122_v5 = vld [vmem:[#allocation8 + $0x100] ss:$16 sps:$4 sm:$0xff]   ;;  %v3130_v6 = vld [vmem:[#allocation8 + $0x124] ss:$16 sps:$4 sm:$0xff]   ;;  %v3125_v7 = vld [vmem:[#allocation8 + $0x108] ss:$16 sps:$4 sm:$0xff]  }
  0x6e   :  { %2138 = vmatprep.subr.bf16.mxu1 %v3079_v36  ;;  %v3133_v8 = vld [vmem:[#allocation8 + $0x12c] ss:$16 sps:$4 sm:$0xff]   ;;  %v3128_v9 = vld [vmem:[#allocation8 + $0x120] ss:$16 sps:$4 sm:$0xff]   ;;  %v3136_v10 = vld [vmem:[#allocation8 + $0x144] ss:$16 sps:$4 sm:$0xff]  }
  0x6f   :  { %2698 = vmatmul.mubr.msk.bf16.vlgmr.msra.gmra.mrb[4].mxu0 %vm232_vm0, %v93_v25  ;;  %v3131_v11 = vld [vmem:[#allocation8 + $0x128] ss:$16 sps:$4 sm:$0xff]   ;;  %v3139_v12 = vld [vmem:[#allocation8 + $0x14c] ss:$16 sps:$4 sm:$0xff]   ;;  %v3134_v13 = vld [vmem:[#allocation8 + $0x140] ss:$16 sps:$4 sm:$0xff]  }
  0x70   :  { %1975 = vmatpush1.bf16.msra.mxu0 %v3074_v37  ;;  %2699 = vmatmul.mubr.msk.bf16.vlgmr.msra.gmra.mrb[4].mxu1 %vm232_vm0, %v93_v25  ;;  %v3142_v14 = vld [vmem:[#allocation8 + $0x164] ss:$16 sps:$4 sm:$0xff]   ;;  %v3137_v15 = vld [vmem:[#allocation8 + $0x148] ss:$16 sps:$4 sm:$0xff]   ;;  %v3145_v16 = vld [vmem:[#allocation8 + $0x16c] ss:$16 sps:$4 sm:$0xff]   ;;  %v112_v37 = vlaneseq }
  0x71   :  { %1976 = vmatprep.subr.bf16.mxu0 %v3082_v38  ;;  %2139 = vmatpush1.bf16.msra.mxu1 %v3077_v39  ;;  %v3140_v17 = vld [vmem:[#allocation8 + $0x160] ss:$16 sps:$4 sm:$0xff]   ;;  %v3148_v18 = vld [vmem:[#allocation8 + $0x184] ss:$16 sps:$4 sm:$0xff]   ;;  %v3143_v19 = vld [vmem:[#allocation8 + $0x168] ss:$16 sps:$4 sm:$0xff]  }
  0x72   :  { %2140 = vmatprep.subr.bf16.mxu1 %v3085_v40  ;;  %v3151_v20 = vld [vmem:[#allocation8 + $0x18c] ss:$16 sps:$4 sm:$0xff]   ;;  %v3146_v21 = vld [vmem:[#allocation8 + $0x180] ss:$16 sps:$4 sm:$0xff]   ;;  %v3154_v22 = vld [vmem:[#allocation8 + $0x1a4] ss:$16 sps:$4 sm:$0xff]  }
  0x73   :  { %v3149_v23 = vld [vmem:[#allocation8 + $0x188] ss:$16 sps:$4 sm:$0xff]   ;;  %v3157_v24 = vld [vmem:[#allocation8 + $0x1ac] ss:$16 sps:$4 sm:$0xff]   ;;  %v3152_v25 = vld [vmem:[#allocation8 + $0x1a0] ss:$16 sps:$4 sm:$0xff]  }
  0x74   :  { %1977 = vmatpush1.bf16.msra.mxu0 %v3080_v41  ;;  %v3155_v26 = vld [vmem:[#allocation8 + $0x1a8] ss:$16 sps:$4 sm:$0xff]   ;;  %v3160_v27 = vld [vmem:[#allocation8 + $0x1c4] ss:$16 sps:$4 sm:$0xff]   ;;  %v3163_v28 = vld [vmem:[#allocation8 + $0x1cc] ss:$16 sps:$4 sm:$0xff]  }
  0x75   :  { %1978 = vmatprep.subr.bf16.mxu0 %v3088_v42  ;;  %2141 = vmatpush1.bf16.msra.mxu1 %v3083_v43  ;;  %v3158_v29 = vld [vmem:[#allocation8 + $0x1c0] ss:$16 sps:$4 sm:$0xff]   ;;  %v3161_v30 = vld [vmem:[#allocation8 + $0x1c8] ss:$16 sps:$4 sm:$0xff]   ;;  %v3166_v31 = vld [vmem:[#allocation8 + $0x1e4] ss:$16 sps:$4 sm:$0xff]  }
  0x76   :  { %2142 = vmatprep.subr.bf16.mxu1 %v3091_v44  ;;  %v3169_v32 = vld [vmem:[#allocation8 + $0x1ec] ss:$16 sps:$4 sm:$0xff]   ;;  %v3164_v33 = vld [vmem:[#allocation8 + $0x1e0] ss:$16 sps:$4 sm:$0xff]   ;;  %v3167_v34 = vld [vmem:[#allocation8 + $0x1e8] ss:$16 sps:$4 sm:$0xff]  }
  0x77   :  { %v3172_v35 = vld [vmem:[#allocation8 + $0x204] ss:$16 sps:$4 sm:$0xff]   ;;  %v3175_v36 = vld [vmem:[#allocation8 + $0x20c] ss:$16 sps:$4 sm:$0xff]   ;;  %v3751_v38 = vshrl.u32 %v112_v37, 7 }
  0x78   :  { %1979 = vmatpush1.bf16.msra.mxu0 %v3086_v45  ;;  %v3754_v40 = vld [vmem:[#allocation7] sm:$0xff]  ;;  %v3220_v37 = vld [vmem:[#allocation8 + $0x304] ss:$16 sps:$4 sm:$0xff]  }
  0x79   :  { %1980 = vmatprep.subr.bf16.mxu0 %v3094_v46  ;;  %2143 = vmatpush1.bf16.msra.mxu1 %v3089_v47  ;;  %v114_v39 = vsub.s32 0, %v3751_v38  ;;  %v118_v41 = vsub.s32 1, %v3751_v38  ;;  %v126_v42 = vsub.s32 3, %v3751_v38 }
  0x7a   :  { %2144 = vmatprep.subr.bf16.mxu1 %v3097_v48 }
  0x7b   :  { %v115_v43 = vrot.slane %v3754_v40, %v114_v39  ;;  %v119_v44 = vrot.slane %v3754_v40, %v118_v41  ;;  %v127_v46 = vrot.slane %v3754_v40, %v126_v42 }
  0x7c   :  { %1981 = vmatpush1.bf16.msra.mxu0 %v3092_v49 }
  0x7d   :  { %1982 = vmatprep.subr.bf16.mxu0 %v3100_v50  ;;  %2145 = vmatpush1.bf16.msra.mxu1 %v3095_v51 }
  0x7e   :  { %2146 = vmatprep.subr.bf16.mxu1 %v3103_v52 }
  0x80   :  { %1983 = vmatpush1.bf16.msra.mxu0 %v3098_v53 }
  0x81   :  { %1984 = vmatprep.subr.bf16.mxu0 %v3106_v54  ;;  %2147 = vmatpush1.bf16.msra.mxu1 %v3101_v55 }
  0x82   :  { %2148 = vmatprep.subr.bf16.mxu1 %v3109_v56 }
  0x84   :  { %1985 = vmatpush1.bf16.msra.mxu0 %v3104_v57 }
  0x85   :  { %1986 = vmatprep.subr.bf16.mxu0 %v3112_v58  ;;  %2149 = vmatpush1.bf16.msra.mxu1 %v3107_v59 }
  0x86   :  { %2150 = vmatprep.subr.bf16.mxu1 %v3115_v60  ;;  %v3170_v60 = vld [vmem:[#allocation8 + $0x200] ss:$16 sps:$4 sm:$0xff]  }
  0x88   :  { %1987 = vmatpush1.bf16.msra.mxu0 %v3110_v61  ;;  %v3173_v61 = vld [vmem:[#allocation8 + $0x208] ss:$16 sps:$4 sm:$0xff]  }
  0x89   :  { %1988 = vmatprep.subr.bf16.mxu0 %v3118_v63  ;;  %2151 = vmatpush1.bf16.msra.mxu1 %v3113_v62 }
  0x8a   :  { %2152 = vmatprep.subr.bf16.mxu1 %v3121_v1  ;;  %v3181_v1 = vld [vmem:[#allocation8 + $0x22c] ss:$16 sps:$4 sm:$0xff]  }
  0x8c   :  { %1989 = vmatpush1.bf16.msra.mxu0 %v3116_v0  ;;  %v3178_v0 = vld [vmem:[#allocation8 + $0x224] ss:$16 sps:$4 sm:$0xff]  }
  0x8d   :  { %1990 = vmatprep.subr.bf16.mxu0 %v3124_v2  ;;  %2153 = vmatpush1.bf16.msra.mxu1 %v3119_v3 }
  0x8e   :  { %2154 = vmatprep.subr.bf16.mxu1 %v3127_v4 }
  0x90   :  { %1991 = vmatpush1.bf16.msra.mxu0 %v3122_v5  ;;  %v3176_v5 = vld [vmem:[#allocation8 + $0x220] ss:$16 sps:$4 sm:$0xff]  }
  0x91   :  { %1992 = vmatprep.subr.bf16.mxu0 %v3130_v6  ;;  %2155 = vmatpush1.bf16.msra.mxu1 %v3125_v7  ;;  %v3179_v6 = vld [vmem:[#allocation8 + $0x228] ss:$16 sps:$4 sm:$0xff]  }
  0x92   :  { %2156 = vmatprep.subr.bf16.mxu1 %v3133_v8  ;;  %v3184_v8 = vld [vmem:[#allocation8 + $0x244] ss:$16 sps:$4 sm:$0xff]  }
  0x94   :  { %1993 = vmatpush1.bf16.msra.mxu0 %v3128_v9  ;;  %v3187_v9 = vld [vmem:[#allocation8 + $0x24c] ss:$16 sps:$4 sm:$0xff]  }
  0x95   :  { %1994 = vmatprep.subr.bf16.mxu0 %v3136_v10  ;;  %2157 = vmatpush1.bf16.msra.mxu1 %v3131_v11  ;;  %v3182_v11 = vld [vmem:[#allocation8 + $0x240] ss:$16 sps:$4 sm:$0xff]  }
  0x96   :  { %2158 = vmatprep.subr.bf16.mxu1 %v3139_v12  ;;  %v3185_v12 = vld [vmem:[#allocation8 + $0x248] ss:$16 sps:$4 sm:$0xff]  }
  0x98   :  { %1995 = vmatpush1.bf16.msra.mxu0 %v3134_v13  ;;  %v3190_v13 = vld [vmem:[#allocation8 + $0x264] ss:$16 sps:$4 sm:$0xff]  }
  0x99   :  { %1996 = vmatprep.subr.bf16.mxu0 %v3142_v14  ;;  %2159 = vmatpush1.bf16.msra.mxu1 %v3137_v15  ;;  %v3193_v14 = vld [vmem:[#allocation8 + $0x26c] ss:$16 sps:$4 sm:$0xff]   ;;  %v3188_v15 = vld [vmem:[#allocation8 + $0x260] ss:$16 sps:$4 sm:$0xff]  }
  0x9a   :  { %2160 = vmatprep.subr.bf16.mxu1 %v3145_v16  ;;  %v3191_v16 = vld [vmem:[#allocation8 + $0x268] ss:$16 sps:$4 sm:$0xff]  }
  0x9c   :  { %1997 = vmatpush1.bf16.msra.mxu0 %v3140_v17  ;;  %v3196_v17 = vld [vmem:[#allocation8 + $0x284] ss:$16 sps:$4 sm:$0xff]  }
  0x9d   :  { %1998 = vmatprep.subr.bf16.mxu0 %v3148_v18  ;;  %2161 = vmatpush1.bf16.msra.mxu1 %v3143_v19  ;;  %v3199_v18 = vld [vmem:[#allocation8 + $0x28c] ss:$16 sps:$4 sm:$0xff]   ;;  %v3194_v19 = vld [vmem:[#allocation8 + $0x280] ss:$16 sps:$4 sm:$0xff]  }
  0x9e   :  { %2162 = vmatprep.subr.bf16.mxu1 %v3151_v20  ;;  %v3197_v20 = vld [vmem:[#allocation8 + $0x288] ss:$16 sps:$4 sm:$0xff]  }
  0xa0   :  { %1999 = vmatpush1.bf16.msra.mxu0 %v3146_v21  ;;  %v3202_v21 = vld [vmem:[#allocation8 + $0x2a4] ss:$16 sps:$4 sm:$0xff]  }
  0xa1   :  { %2000 = vmatprep.subr.bf16.mxu0 %v3154_v22  ;;  %2163 = vmatpush1.bf16.msra.mxu1 %v3149_v23  ;;  %v3205_v22 = vld [vmem:[#allocation8 + $0x2ac] ss:$16 sps:$4 sm:$0xff]   ;;  %v3200_v23 = vld [vmem:[#allocation8 + $0x2a0] ss:$16 sps:$4 sm:$0xff]  }
  0xa2   :  { %2164 = vmatprep.subr.bf16.mxu1 %v3157_v24  ;;  %v3203_v24 = vld [vmem:[#allocation8 + $0x2a8] ss:$16 sps:$4 sm:$0xff]  }
  0xa4   :  { %2001 = vmatpush1.bf16.msra.mxu0 %v3152_v25 }
  0xa5   :  { %2165 = vmatpush1.bf16.msra.mxu1 %v3155_v26  ;;  %2002 = vmatprep.subr.bf16.mxu0 %v3160_v27  ;;  %v3208_v26 = vld [vmem:[#allocation8 + $0x2c4] ss:$16 sps:$4 sm:$0xff]   ;;  %v3211_v27 = vld [vmem:[#allocation8 + $0x2cc] ss:$16 sps:$4 sm:$0xff]  }
  0xa6   :  { %2166 = vmatprep.subr.bf16.mxu1 %v3163_v28 }
  0xa8   :  { %2003 = vmatpush1.bf16.msra.mxu0 %v3158_v29 }
  0xa9   :  { %2167 = vmatpush1.bf16.msra.mxu1 %v3161_v30  ;;  %2004 = vmatprep.subr.bf16.mxu0 %v3166_v31  ;;  %v3206_v31 = vld [vmem:[#allocation8 + $0x2c0] ss:$16 sps:$4 sm:$0xff]  }
  0xaa   :  { %2168 = vmatprep.subr.bf16.mxu1 %v3169_v32  ;;  %v3209_v32 = vld [vmem:[#allocation8 + $0x2c8] ss:$16 sps:$4 sm:$0xff]  }
  0xac   :  { %2005 = vmatpush1.bf16.msra.mxu0 %v3164_v33  ;;  %v3214_v33 = vld [vmem:[#allocation8 + $0x2e4] ss:$16 sps:$4 sm:$0xff]  }
  0xad   :  { %2169 = vmatpush1.bf16.msra.mxu1 %v3167_v34  ;;  %2015 = vmatprep.subr.bf16.mxu0 %v3172_v35  ;;  %v3217_v34 = vld [vmem:[#allocation8 + $0x2ec] ss:$16 sps:$4 sm:$0xff]   ;;  %v3212_v35 = vld [vmem:[#allocation8 + $0x2e0] ss:$16 sps:$4 sm:$0xff]  }
  0xae   :  { %2179 = vmatprep.subr.bf16.mxu1 %v3175_v36  ;;  %v3215_v36 = vld [vmem:[#allocation8 + $0x2e8] ss:$16 sps:$4 sm:$0xff]  }
 0x13a   :  { %v270_v45 = vpop.f32.mrb[0].mxu0  ;;  %v3767_v51 = vpop.f32.mrb[0].mxu1 }
 0x13b   :  { %v271_v47 = vadd.f32 %v270_v45, %v115_v43  ;;  %v272_v48 = vpop.f32.mrb[1].mxu0  ;;  %v313_v54 = vpop.f32.mrb[1].mxu1  ;;  %v3223_v43 = vld [vmem:[#allocation8 + $0x30c] ss:$16 sps:$4 sm:$0xff]   ;;  %v3221_v45 = vld [vmem:[#allocation8 + $0x308] ss:$16 sps:$4 sm:$0xff]  }
 0x13c   :  { %v273_v49 = vadd.f32 %v272_v48, %v119_v44  ;;  %v274_v50 = vpop.f32.mrb[2].mxu0  ;;  %v314_v56 = vadd.f32 %v313_v54, %v127_v46  ;;  %v315_v57 = vpop.f32.mrb[2].mxu1  ;;  %v3218_v44 = vld [vmem:[#allocation8 + $0x300] ss:$16 sps:$4 sm:$0xff]   ;;  %v3226_v46 = vld [vmem:[#allocation8 + $0x324] ss:$16 sps:$4 sm:$0xff]  }
 0x13d   :  { %v400_v52 = vmax.f32 %v271_v47, 0.0  ;;  %v275_v53 = vpop.f32.mrb[3].mxu0  ;;  %v316_v58 = vpop.f32.mrb[3].mxu1  ;;  %v3229_v47 = vld [vmem:[#allocation8 + $0x32c] ss:$16 sps:$4 sm:$0xff]  }
 0x13e   :  { %v401_v55 = vmax.f32 %v273_v49, 0.0  ;;  %v403_v62 = vmax.f32 %v314_v56, 0.0  ;;  %v3224_v48 = vld [vmem:[#allocation8 + $0x320] ss:$16 sps:$4 sm:$0xff]   ;;  %v3227_v49 = vld [vmem:[#allocation8 + $0x328] ss:$16 sps:$4 sm:$0xff]  }
 0x13f   :  { %v408_v63 = vpack.c.bf16 %v400_v52, %v400_v52  ;;  %v3232_v50 = vld [vmem:[#allocation8 + $0x344] ss:$16 sps:$4 sm:$0xff]   ;;  %v3235_v52 = vld [vmem:[#allocation8 + $0x34c] ss:$16 sps:$4 sm:$0xff]   ;;  %v3230_v53 = vld [vmem:[#allocation8 + $0x340] ss:$16 sps:$4 sm:$0xff]  }
 0x140   :  { %v409_v59 = vpack.c.bf16 %v401_v55, %v401_v55  ;;  %v411_v2 = vpack.c.bf16 %v403_v62, %v403_v62  ;;  %v3233_v54 = vld [vmem:[#allocation8 + $0x348] ss:$16 sps:$4 sm:$0xff]   ;;  %v3238_v55 = vld [vmem:[#allocation8 + $0x364] ss:$16 sps:$4 sm:$0xff]   ;;  %v3241_v56 = vld [vmem:[#allocation8 + $0x36c] ss:$16 sps:$4 sm:$0xff]  }
 0x141   :  { %v3236_v57 = vld [vmem:[#allocation8 + $0x360] ss:$16 sps:$4 sm:$0xff]   ;;  %v3239_v58 = vld [vmem:[#allocation8 + $0x368] ss:$16 sps:$4 sm:$0xff]  }
 0x142   :  { %2006 = vmatprep.mubr.bf16.mxu0 %v409_v59  ;;  %2170 = vmatprep.mubr.bf16.mxu1 %v409_v59  ;;  %v3769_v3 = vpop.f32.mrb[4].mxu0  ;;  %v3244_v59 = vld [vmem:[#allocation8 + $0x384] ss:$16 sps:$4 sm:$0xff]   ;;  %v3242_v62 = vld [vmem:[#allocation8 + $0x380] ss:$16 sps:$4 sm:$0xff]  }
 0x143   :  { %2007 = vmatmul.mubr.bf16.vlgmr.msra.gmra.mrb[8].mxu0 %v408_v63  ;;  %2171 = vmatmul.mubr.bf16.vlgmr.msra.gmra.mrb[8].mxu1 %v408_v63  ;;  %v3771_v4 = vpop.f32.mrb[5].mxu0  ;;  %v3773_v25 = vpop.f32.mrb[4].mxu1  ;;  %v3245_v63 = vld [vmem:[#allocation8 + $0x388] ss:$16 sps:$4 sm:$0xff]  }
 0x144   :  { %2016 = vmatpush1.bf16.msra.mxu0 %v3170_v60  ;;  %2180 = vmatpush1.bf16.msra.mxu1 %v3173_v61  ;;  %v356_v7 = vpop.f32.mrb[6].mxu0  ;;  %v3775_v28 = vpop.f32.mrb[5].mxu1  ;;  %v3247_v60 = vld [vmem:[#allocation8 + $0x38c] ss:$16 sps:$4 sm:$0xff]   ;;  %v122_v61 = vsub.s32 2, %v3751_v38 }
 0x145   :  { %2017 = vmatprep.subr.bf16.mxu0 %v3178_v0  ;;  %2181 = vmatprep.subr.bf16.mxu1 %v3181_v1  ;;  %v357_v10 = vpop.f32.mrb[7].mxu0  ;;  %v397_v29 = vpop.f32.mrb[6].mxu1  ;;  %v3250_v0 = vld [vmem:[#allocation8 + $0x3a4] ss:$16 sps:$4 sm:$0xff]   ;;  %v3253_v1 = vld [vmem:[#allocation8 + $0x3ac] ss:$16 sps:$4 sm:$0xff]  }
 0x146   :  { %2047 = vmatprep.mubr.bf16.mxu0 %v411_v2  ;;  %2211 = vmatprep.mubr.bf16.mxu1 %v411_v2  ;;  %v398_v30 = vpop.f32.mrb[7].mxu1  ;;  %v134_v2 = vsub.s32 5, %v3751_v38  ;;  %v3251_v7 = vld [vmem:[#allocation8 + $0x3a8] ss:$16 sps:$4 sm:$0xff]   ;;  %v3272_v29 = vld [vmem:[#allocation8 + $0x420] ss:$16 sps:$4 sm:$0xff]  }
 0x147   :  { %v3275_v30 = vld [vmem:[#allocation8 + $0x428] ss:$16 sps:$4 sm:$0xff]  }
 0x148   :  { %2018 = vmatpush1.bf16.msra.mxu0 %v3176_v5  ;;  %2182 = vmatpush1.bf16.msra.mxu1 %v3179_v6  ;;  %v123_v5 = vrot.slane %v3754_v40, %v122_v61  ;;  %v3248_v6 = vld [vmem:[#allocation8 + $0x3a0] ss:$16 sps:$4 sm:$0xff]   ;;  %v135_v10 = vrot.slane %v3754_v40, %v134_v2  ;;  %v3322_v2 = vld [vmem:[#allocation8 + $0x524] ss:$16 sps:$4 sm:$0xff]  }
 0x149   :  { %2019 = vmatprep.subr.bf16.mxu0 %v3184_v8  ;;  %2183 = vmatprep.subr.bf16.mxu1 %v3187_v9  ;;  %v3256_v8 = vld [vmem:[#allocation8 + $0x3c4] ss:$16 sps:$4 sm:$0xff]   ;;  %v3259_v9 = vld [vmem:[#allocation8 + $0x3cc] ss:$16 sps:$4 sm:$0xff]  }
 0x14c   :  { %2020 = vmatpush1.bf16.msra.mxu0 %v3182_v11  ;;  %2184 = vmatpush1.bf16.msra.mxu1 %v3185_v12  ;;  %v312_v11 = vadd.f32 %v3767_v51, %v123_v5  ;;  %v3254_v12 = vld [vmem:[#allocation8 + $0x3c0] ss:$16 sps:$4 sm:$0xff]   ;;  %v3325_v5 = vld [vmem:[#allocation8 + $0x52c] ss:$16 sps:$4 sm:$0xff]  }
 0x14d   :  { %2021 = vmatprep.subr.bf16.mxu0 %v3190_v13  ;;  %2185 = vmatprep.subr.bf16.mxu1 %v3193_v14  ;;  %v3257_v13 = vld [vmem:[#allocation8 + $0x3c8] ss:$16 sps:$4 sm:$0xff]   ;;  %v3262_v14 = vld [vmem:[#allocation8 + $0x3e4] ss:$16 sps:$4 sm:$0xff]  }
 0x150   :  { %2022 = vmatpush1.bf16.msra.mxu0 %v3188_v15  ;;  %2186 = vmatpush1.bf16.msra.mxu1 %v3191_v16  ;;  %v3265_v15 = vld [vmem:[#allocation8 + $0x3ec] ss:$16 sps:$4 sm:$0xff]   ;;  %v355_v16 = vadd.f32 %v3771_v4, %v135_v10  ;;  %v3326_v10 = vld [vmem:[#allocation8 + $0x540] ss:$16 sps:$4 sm:$0xff]  }
 0x151   :  { %2023 = vmatprep.subr.bf16.mxu0 %v3196_v17  ;;  %2187 = vmatprep.subr.bf16.mxu1 %v3199_v18  ;;  %v402_v17 = vmax.f32 %v312_v11, 0.0  ;;  %v3260_v18 = vld [vmem:[#allocation8 + $0x3e0] ss:$16 sps:$4 sm:$0xff]   ;;  %v3329_v11 = vld [vmem:[#allocation8 + $0x548] ss:$16 sps:$4 sm:$0xff]  }
 0x152   :  { %v405_v51 = vmax.f32 %v355_v16, 0.0  ;;  %v3340_v16 = vld [vmem:[#allocation8 + $0x584] ss:$16 sps:$4 sm:$0xff]  }
 0x154   :  { %2024 = vmatpush1.bf16.msra.mxu0 %v3194_v19  ;;  %2188 = vmatpush1.bf16.msra.mxu1 %v3197_v20  ;;  %v3263_v19 = vld [vmem:[#allocation8 + $0x3e8] ss:$16 sps:$4 sm:$0xff]   ;;  %v3268_v20 = vld [vmem:[#allocation8 + $0x404] ss:$16 sps:$4 sm:$0xff]   ;;  %v413_v4 = vpack.c.bf16 %v405_v51, %v405_v51  ;;  %v3349_v51 = vld [vmem:[#allocation8 + $0x5ac] ss:$16 sps:$4 sm:$0xff]  }
 0x155   :  { %2025 = vmatprep.subr.bf16.mxu0 %v3202_v21  ;;  %2189 = vmatprep.subr.bf16.mxu1 %v3205_v22  ;;  %v3271_v21 = vld [vmem:[#allocation8 + $0x40c] ss:$16 sps:$4 sm:$0xff]   ;;  %v410_v22 = vpack.c.bf16 %v402_v17, %v402_v17 }
 0x156   :  { %v3343_v17 = vld [vmem:[#allocation8 + $0x58c] ss:$16 sps:$4 sm:$0xff]  }
 0x158   :  { %2026 = vmatpush1.bf16.msra.mxu0 %v3200_v23  ;;  %2190 = vmatpush1.bf16.msra.mxu1 %v3203_v24  ;;  %v3266_v23 = vld [vmem:[#allocation8 + $0x400] ss:$16 sps:$4 sm:$0xff]   ;;  %v3269_v24 = vld [vmem:[#allocation8 + $0x408] ss:$16 sps:$4 sm:$0xff]  }
 0x159   :  { %2027 = vmatprep.subr.bf16.mxu0 %v3208_v26  ;;  %2191 = vmatprep.subr.bf16.mxu1 %v3211_v27  ;;  %v3274_v26 = vld [vmem:[#allocation8 + $0x424] ss:$16 sps:$4 sm:$0xff]   ;;  %v3277_v27 = vld [vmem:[#allocation8 + $0x42c] ss:$16 sps:$4 sm:$0xff]  }
 0x15c   :  { %2028 = vmatpush1.bf16.msra.mxu0 %v3206_v31  ;;  %2192 = vmatpush1.bf16.msra.mxu1 %v3209_v32  ;;  %v3280_v31 = vld [vmem:[#allocation8 + $0x444] ss:$16 sps:$4 sm:$0xff]   ;;  %v3283_v32 = vld [vmem:[#allocation8 + $0x44c] ss:$16 sps:$4 sm:$0xff]  }
 0x15d   :  { %2029 = vmatprep.subr.bf16.mxu0 %v3214_v33  ;;  %2193 = vmatprep.subr.bf16.mxu1 %v3217_v34  ;;  %v3278_v33 = vld [vmem:[#allocation8 + $0x440] ss:$16 sps:$4 sm:$0xff]   ;;  %v3281_v34 = vld [vmem:[#allocation8 + $0x448] ss:$16 sps:$4 sm:$0xff]  }
 0x160   :  { %2030 = vmatpush1.bf16.msra.mxu0 %v3212_v35  ;;  %2194 = vmatpush1.bf16.msra.mxu1 %v3215_v36  ;;  %v3286_v35 = vld [vmem:[#allocation8 + $0x464] ss:$16 sps:$4 sm:$0xff]   ;;  %v3289_v36 = vld [vmem:[#allocation8 + $0x46c] ss:$16 sps:$4 sm:$0xff]  }
 0x161   :  { %2031 = vmatprep.subr.bf16.mxu0 %v3220_v37  ;;  %2195 = vmatprep.subr.bf16.mxu1 %v3223_v43  ;;  %v3284_v37 = vld [vmem:[#allocation8 + $0x460] ss:$16 sps:$4 sm:$0xff]   ;;  %v3287_v43 = vld [vmem:[#allocation8 + $0x468] ss:$16 sps:$4 sm:$0xff]  }
 0x164   :  { %2032 = vmatpush1.bf16.msra.mxu0 %v3218_v44  ;;  %2196 = vmatpush1.bf16.msra.mxu1 %v3221_v45  ;;  %v3292_v44 = vld [vmem:[#allocation8 + $0x484] ss:$16 sps:$4 sm:$0xff]   ;;  %v3295_v45 = vld [vmem:[#allocation8 + $0x48c] ss:$16 sps:$4 sm:$0xff]  }
 0x165   :  { %2033 = vmatprep.subr.bf16.mxu0 %v3226_v46  ;;  %2197 = vmatprep.subr.bf16.mxu1 %v3229_v47  ;;  %v3290_v46 = vld [vmem:[#allocation8 + $0x480] ss:$16 sps:$4 sm:$0xff]   ;;  %v3293_v47 = vld [vmem:[#allocation8 + $0x488] ss:$16 sps:$4 sm:$0xff]  }
 0x168   :  { %2034 = vmatpush1.bf16.msra.mxu0 %v3224_v48  ;;  %2198 = vmatpush1.bf16.msra.mxu1 %v3227_v49  ;;  %v3298_v48 = vld [vmem:[#allocation8 + $0x4a4] ss:$16 sps:$4 sm:$0xff]   ;;  %v3301_v49 = vld [vmem:[#allocation8 + $0x4ac] ss:$16 sps:$4 sm:$0xff]  }
 0x169   :  { %2035 = vmatprep.subr.bf16.mxu0 %v3232_v50  ;;  %2199 = vmatprep.subr.bf16.mxu1 %v3235_v52  ;;  %v3296_v50 = vld [vmem:[#allocation8 + $0x4a0] ss:$16 sps:$4 sm:$0xff]   ;;  %v3299_v52 = vld [vmem:[#allocation8 + $0x4a8] ss:$16 sps:$4 sm:$0xff]  }
 0x16c   :  { %2036 = vmatpush1.bf16.msra.mxu0 %v3230_v53  ;;  %2200 = vmatpush1.bf16.msra.mxu1 %v3233_v54  ;;  %v3304_v53 = vld [vmem:[#allocation8 + $0x4c4] ss:$16 sps:$4 sm:$0xff]   ;;  %v3307_v54 = vld [vmem:[#allocation8 + $0x4cc] ss:$16 sps:$4 sm:$0xff]  }
 0x16d   :  { %2037 = vmatprep.subr.bf16.mxu0 %v3238_v55  ;;  %2201 = vmatprep.subr.bf16.mxu1 %v3241_v56  ;;  %v3302_v55 = vld [vmem:[#allocation8 + $0x4c0] ss:$16 sps:$4 sm:$0xff]   ;;  %v3305_v56 = vld [vmem:[#allocation8 + $0x4c8] ss:$16 sps:$4 sm:$0xff]  }
 0x170   :  { %2038 = vmatpush1.bf16.msra.mxu0 %v3236_v57  ;;  %2202 = vmatpush1.bf16.msra.mxu1 %v3239_v58  ;;  %v3310_v57 = vld [vmem:[#allocation8 + $0x4e4] ss:$16 sps:$4 sm:$0xff]   ;;  %v3313_v58 = vld [vmem:[#allocation8 + $0x4ec] ss:$16 sps:$4 sm:$0xff]  }
 0x171   :  { %2039 = vmatprep.subr.bf16.mxu0 %v3244_v59  ;;  %2203 = vmatprep.subr.bf16.mxu1 %v3247_v60  ;;  %v3308_v59 = vld [vmem:[#allocation8 + $0x4e0] ss:$16 sps:$4 sm:$0xff]   ;;  %v3311_v60 = vld [vmem:[#allocation8 + $0x4e8] ss:$16 sps:$4 sm:$0xff]  }
 0x174   :  { %2040 = vmatpush1.bf16.msra.mxu0 %v3242_v62  ;;  %2204 = vmatpush1.bf16.msra.mxu1 %v3245_v63  ;;  %v3316_v62 = vld [vmem:[#allocation8 + $0x504] ss:$16 sps:$4 sm:$0xff]   ;;  %v3319_v63 = vld [vmem:[#allocation8 + $0x50c] ss:$16 sps:$4 sm:$0xff]  }
 0x175   :  { %2041 = vmatprep.subr.bf16.mxu0 %v3250_v0  ;;  %2205 = vmatprep.subr.bf16.mxu1 %v3253_v1  ;;  %v3314_v0 = vld [vmem:[#allocation8 + $0x500] ss:$16 sps:$4 sm:$0xff]   ;;  %v3317_v1 = vld [vmem:[#allocation8 + $0x508] ss:$16 sps:$4 sm:$0xff]  }
 0x178   :  { %2042 = vmatpush1.bf16.msra.mxu0 %v3248_v6  ;;  %2206 = vmatpush1.bf16.msra.mxu1 %v3251_v7  ;;  %v3320_v6 = vld [vmem:[#allocation8 + $0x520] ss:$16 sps:$4 sm:$0xff]   ;;  %v3323_v7 = vld [vmem:[#allocation8 + $0x528] ss:$16 sps:$4 sm:$0xff]  }
 0x179   :  { %2043 = vmatprep.subr.bf16.mxu0 %v3256_v8  ;;  %2207 = vmatprep.subr.bf16.mxu1 %v3259_v9  ;;  %v3328_v8 = vld [vmem:[#allocation8 + $0x544] ss:$16 sps:$4 sm:$0xff]   ;;  %v3331_v9 = vld [vmem:[#allocation8 + $0x54c] ss:$16 sps:$4 sm:$0xff]  }
 0x17c   :  { %2044 = vmatpush1.bf16.msra.mxu0 %v3254_v12  ;;  %2208 = vmatpush1.bf16.msra.mxu1 %v3257_v13  ;;  %v3334_v12 = vld [vmem:[#allocation8 + $0x564] ss:$16 sps:$4 sm:$0xff]   ;;  %v3337_v13 = vld [vmem:[#allocation8 + $0x56c] ss:$16 sps:$4 sm:$0xff]  }
 0x17d   :  { %2045 = vmatprep.subr.bf16.mxu0 %v3262_v14  ;;  %2209 = vmatprep.subr.bf16.mxu1 %v3265_v15  ;;  %v3332_v14 = vld [vmem:[#allocation8 + $0x560] ss:$16 sps:$4 sm:$0xff]   ;;  %v3335_v15 = vld [vmem:[#allocation8 + $0x568] ss:$16 sps:$4 sm:$0xff]  }
 0x180   :  { %2046 = vmatpush1.bf16.msra.mxu0 %v3260_v18  ;;  %2210 = vmatpush1.bf16.msra.mxu1 %v3263_v19  ;;  %v130_v18 = vsub.s32 4, %v3751_v38  ;;  %v3338_v19 = vld [vmem:[#allocation8 + $0x580] ss:$16 sps:$4 sm:$0xff]  }
 0x181   :  { %2056 = vmatprep.subr.bf16.mxu0 %v3268_v20  ;;  %2220 = vmatprep.subr.bf16.mxu1 %v3271_v21  ;;  %v3341_v20 = vld [vmem:[#allocation8 + $0x588] ss:$16 sps:$4 sm:$0xff]   ;;  %v3346_v21 = vld [vmem:[#allocation8 + $0x5a4] ss:$16 sps:$4 sm:$0xff]  }
 0x183   :  { %2048 = vmatmul.mubr.bf16.vlgmr.msra.gmra.mrb[8].mxu0 %v410_v22  ;;  %2212 = vmatmul.mubr.bf16.vlgmr.msra.gmra.mrb[8].mxu1 %v410_v22  ;;  %v142_v22 = vsub.s32 7, %v3751_v38 }
 0x184   :  { %2057 = vmatpush1.bf16.msra.mxu0 %v3266_v23  ;;  %2221 = vmatpush1.bf16.msra.mxu1 %v3269_v24  ;;  %v131_v23 = vrot.slane %v3754_v40, %v130_v18  ;;  %v3344_v24 = vld [vmem:[#allocation8 + $0x5a0] ss:$16 sps:$4 sm:$0xff]   ;;  %v3415_v18 = vld [vmem:[#allocation8 + $0x70c] ss:$16 sps:$4 sm:$0xff]  }
 0x185   :  { %2058 = vmatprep.subr.bf16.mxu0 %v3274_v26  ;;  %2222 = vmatprep.subr.bf16.mxu1 %v3277_v27  ;;  %v3347_v26 = vld [vmem:[#allocation8 + $0x5a8] ss:$16 sps:$4 sm:$0xff]   ;;  %v3352_v27 = vld [vmem:[#allocation8 + $0x5c4] ss:$16 sps:$4 sm:$0xff]  }
 0x186   :  { %2088 = vmatprep.mubr.bf16.mxu0 %v413_v4  ;;  %2252 = vmatprep.mubr.bf16.mxu1 %v413_v4  ;;  %v3355_v4 = vld [vmem:[#allocation8 + $0x5cc] ss:$16 sps:$4 sm:$0xff]  }
 0x188   :  { %2059 = vmatpush1.bf16.msra.mxu0 %v3272_v29  ;;  %2223 = vmatpush1.bf16.msra.mxu1 %v3275_v30  ;;  %v143_v29 = vrot.slane %v3754_v40, %v142_v22  ;;  %v353_v30 = vadd.f32 %v3769_v3, %v131_v23  ;;  %v3416_v22 = vld [vmem:[#allocation8 + $0x720] ss:$16 sps:$4 sm:$0xff]   ;;  %v3419_v23 = vld [vmem:[#allocation8 + $0x728] ss:$16 sps:$4 sm:$0xff]  }
 0x189   :  { %2060 = vmatprep.subr.bf16.mxu0 %v3280_v31  ;;  %2224 = vmatprep.subr.bf16.mxu1 %v3283_v32  ;;  %v3350_v31 = vld [vmem:[#allocation8 + $0x5c0] ss:$16 sps:$4 sm:$0xff]   ;;  %v3353_v32 = vld [vmem:[#allocation8 + $0x5c8] ss:$16 sps:$4 sm:$0xff]  }
 0x18c   :  { %2061 = vmatpush1.bf16.msra.mxu0 %v3278_v33  ;;  %2225 = vmatpush1.bf16.msra.mxu1 %v3281_v34  ;;  %v3358_v33 = vld [vmem:[#allocation8 + $0x5e4] ss:$16 sps:$4 sm:$0xff]   ;;  %v3361_v34 = vld [vmem:[#allocation8 + $0x5ec] ss:$16 sps:$4 sm:$0xff]  }
 0x18d   :  { %2062 = vmatprep.subr.bf16.mxu0 %v3286_v35  ;;  %2226 = vmatprep.subr.bf16.mxu1 %v3289_v36  ;;  %v396_v35 = vadd.f32 %v3775_v28, %v143_v29  ;;  %v404_v36 = vmax.f32 %v353_v30, 0.0  ;;  %v3430_v29 = vld [vmem:[#allocation8 + $0x764] ss:$16 sps:$4 sm:$0xff]   ;;  %v3433_v30 = vld [vmem:[#allocation8 + $0x76c] ss:$16 sps:$4 sm:$0xff]  }
 0x18f   :  { %v407_v3 = vmax.f32 %v396_v35, 0.0  ;;  %v3434_v35 = vld [vmem:[#allocation8 + $0x780] ss:$16 sps:$4 sm:$0xff]  }
 0x190   :  { %2063 = vmatpush1.bf16.msra.mxu0 %v3284_v37  ;;  %2227 = vmatpush1.bf16.msra.mxu1 %v3287_v43  ;;  %v3356_v37 = vld [vmem:[#allocation8 + $0x5e0] ss:$16 sps:$4 sm:$0xff]   ;;  %v3359_v43 = vld [vmem:[#allocation8 + $0x5e8] ss:$16 sps:$4 sm:$0xff]  }
 0x191   :  { %2064 = vmatprep.subr.bf16.mxu0 %v3292_v44  ;;  %2228 = vmatprep.subr.bf16.mxu1 %v3295_v45  ;;  %v3364_v44 = vld [vmem:[#allocation8 + $0x604] ss:$16 sps:$4 sm:$0xff]   ;;  %v3367_v45 = vld [vmem:[#allocation8 + $0x60c] ss:$16 sps:$4 sm:$0xff]   ;;  %v415_v28 = vpack.c.bf16 %v407_v3, %v407_v3  ;;  %v3443_v3 = vld [vmem:[#allocation8 + $0x7a8] ss:$16 sps:$4 sm:$0xff]  }
 0x194   :  { %2065 = vmatpush1.bf16.msra.mxu0 %v3290_v46  ;;  %2229 = vmatpush1.bf16.msra.mxu1 %v3293_v47  ;;  %v412_v46 = vpack.c.bf16 %v404_v36, %v404_v36  ;;  %v3362_v47 = vld [vmem:[#allocation8 + $0x600] ss:$16 sps:$4 sm:$0xff]   ;;  %v3437_v36 = vld [vmem:[#allocation8 + $0x788] ss:$16 sps:$4 sm:$0xff]  }
 0x195   :  { %2066 = vmatprep.subr.bf16.mxu0 %v3298_v48  ;;  %2230 = vmatprep.subr.bf16.mxu1 %v3301_v49  ;;  %v3365_v48 = vld [vmem:[#allocation8 + $0x608] ss:$16 sps:$4 sm:$0xff]   ;;  %v3370_v49 = vld [vmem:[#allocation8 + $0x624] ss:$16 sps:$4 sm:$0xff]  }
 0x198   :  { %2067 = vmatpush1.bf16.msra.mxu0 %v3296_v50  ;;  %2231 = vmatpush1.bf16.msra.mxu1 %v3299_v52  ;;  %v3373_v50 = vld [vmem:[#allocation8 + $0x62c] ss:$16 sps:$4 sm:$0xff]   ;;  %v3368_v52 = vld [vmem:[#allocation8 + $0x620] ss:$16 sps:$4 sm:$0xff]  }
 0x199   :  { %2068 = vmatprep.subr.bf16.mxu0 %v3304_v53  ;;  %2232 = vmatprep.subr.bf16.mxu1 %v3307_v54  ;;  %v3371_v53 = vld [vmem:[#allocation8 + $0x628] ss:$16 sps:$4 sm:$0xff]   ;;  %v3376_v54 = vld [vmem:[#allocation8 + $0x644] ss:$16 sps:$4 sm:$0xff]  }
 0x19c   :  { %2069 = vmatpush1.bf16.msra.mxu0 %v3302_v55  ;;  %2233 = vmatpush1.bf16.msra.mxu1 %v3305_v56  ;;  %v3379_v55 = vld [vmem:[#allocation8 + $0x64c] ss:$16 sps:$4 sm:$0xff]   ;;  %v3374_v56 = vld [vmem:[#allocation8 + $0x640] ss:$16 sps:$4 sm:$0xff]  }
 0x19d   :  { %2070 = vmatprep.subr.bf16.mxu0 %v3310_v57  ;;  %2234 = vmatprep.subr.bf16.mxu1 %v3313_v58  ;;  %v3377_v57 = vld [vmem:[#allocation8 + $0x648] ss:$16 sps:$4 sm:$0xff]   ;;  %v3382_v58 = vld [vmem:[#allocation8 + $0x664] ss:$16 sps:$4 sm:$0xff]  }
 0x1a0   :  { %2071 = vmatpush1.bf16.msra.mxu0 %v3308_v59  ;;  %2235 = vmatpush1.bf16.msra.mxu1 %v3311_v60  ;;  %v3385_v59 = vld [vmem:[#allocation8 + $0x66c] ss:$16 sps:$4 sm:$0xff]   ;;  %v3380_v60 = vld [vmem:[#allocation8 + $0x660] ss:$16 sps:$4 sm:$0xff]  }
 0x1a1   :  { %2072 = vmatprep.subr.bf16.mxu0 %v3316_v62  ;;  %2236 = vmatprep.subr.bf16.mxu1 %v3319_v63  ;;  %v3383_v62 = vld [vmem:[#allocation8 + $0x668] ss:$16 sps:$4 sm:$0xff]   ;;  %v3388_v63 = vld [vmem:[#allocation8 + $0x684] ss:$16 sps:$4 sm:$0xff]  }
 0x1a4   :  { %2073 = vmatpush1.bf16.msra.mxu0 %v3314_v0  ;;  %2237 = vmatpush1.bf16.msra.mxu1 %v3317_v1  ;;  %v3391_v0 = vld [vmem:[#allocation8 + $0x68c] ss:$16 sps:$4 sm:$0xff]   ;;  %v3386_v1 = vld [vmem:[#allocation8 + $0x680] ss:$16 sps:$4 sm:$0xff]  }
 0x1a5   :  { %2074 = vmatprep.subr.bf16.mxu0 %v3322_v2  ;;  %2238 = vmatprep.subr.bf16.mxu1 %v3325_v5  ;;  %v3389_v2 = vld [vmem:[#allocation8 + $0x688] ss:$16 sps:$4 sm:$0xff]   ;;  %v3394_v5 = vld [vmem:[#allocation8 + $0x6a4] ss:$16 sps:$4 sm:$0xff]  }
 0x1a8   :  { %2075 = vmatpush1.bf16.msra.mxu0 %v3320_v6  ;;  %2239 = vmatpush1.bf16.msra.mxu1 %v3323_v7  ;;  %v3397_v6 = vld [vmem:[#allocation8 + $0x6ac] ss:$16 sps:$4 sm:$0xff]   ;;  %v3392_v7 = vld [vmem:[#allocation8 + $0x6a0] ss:$16 sps:$4 sm:$0xff]  }
 0x1a9   :  { %2076 = vmatprep.subr.bf16.mxu0 %v3328_v8  ;;  %2240 = vmatprep.subr.bf16.mxu1 %v3331_v9  ;;  %v3395_v8 = vld [vmem:[#allocation8 + $0x6a8] ss:$16 sps:$4 sm:$0xff]   ;;  %v3400_v9 = vld [vmem:[#allocation8 + $0x6c4] ss:$16 sps:$4 sm:$0xff]  }
 0x1ac   :  { %2077 = vmatpush1.bf16.msra.mxu0 %v3326_v10  ;;  %2241 = vmatpush1.bf16.msra.mxu1 %v3329_v11  ;;  %v3403_v10 = vld [vmem:[#allocation8 + $0x6cc] ss:$16 sps:$4 sm:$0xff]   ;;  %v3398_v11 = vld [vmem:[#allocation8 + $0x6c0] ss:$16 sps:$4 sm:$0xff]  }
 0x1ad   :  { %2078 = vmatprep.subr.bf16.mxu0 %v3334_v12  ;;  %2242 = vmatprep.subr.bf16.mxu1 %v3337_v13  ;;  %v3401_v12 = vld [vmem:[#allocation8 + $0x6c8] ss:$16 sps:$4 sm:$0xff]   ;;  %v3406_v13 = vld [vmem:[#allocation8 + $0x6e4] ss:$16 sps:$4 sm:$0xff]  }
 0x1b0   :  { %2079 = vmatpush1.bf16.msra.mxu0 %v3332_v14  ;;  %2243 = vmatpush1.bf16.msra.mxu1 %v3335_v15  ;;  %v3409_v14 = vld [vmem:[#allocation8 + $0x6ec] ss:$16 sps:$4 sm:$0xff]   ;;  %v3404_v15 = vld [vmem:[#allocation8 + $0x6e0] ss:$16 sps:$4 sm:$0xff]  }
 0x1b1   :  { %2080 = vmatprep.subr.bf16.mxu0 %v3340_v16  ;;  %2244 = vmatprep.subr.bf16.mxu1 %v3343_v17  ;;  %v3407_v16 = vld [vmem:[#allocation8 + $0x6e8] ss:$16 sps:$4 sm:$0xff]   ;;  %v3412_v17 = vld [vmem:[#allocation8 + $0x704] ss:$16 sps:$4 sm:$0xff]  }
 0x1b4   :  { %2081 = vmatpush1.bf16.msra.mxu0 %v3338_v19  ;;  %2245 = vmatpush1.bf16.msra.mxu1 %v3341_v20  ;;  %v3410_v19 = vld [vmem:[#allocation8 + $0x700] ss:$16 sps:$4 sm:$0xff]   ;;  %v3413_v20 = vld [vmem:[#allocation8 + $0x708] ss:$16 sps:$4 sm:$0xff]  }
 0x1b5   :  { %2082 = vmatprep.subr.bf16.mxu0 %v3346_v21  ;;  %2246 = vmatprep.subr.bf16.mxu1 %v3349_v51  ;;  %v3418_v21 = vld [vmem:[#allocation8 + $0x724] ss:$16 sps:$4 sm:$0xff]   ;;  %v3421_v51 = vld [vmem:[#allocation8 + $0x72c] ss:$16 sps:$4 sm:$0xff]  }
 0x1b8   :  { %2083 = vmatpush1.bf16.msra.mxu0 %v3344_v24  ;;  %2247 = vmatpush1.bf16.msra.mxu1 %v3347_v26  ;;  %v3424_v24 = vld [vmem:[#allocation8 + $0x744] ss:$16 sps:$4 sm:$0xff]   ;;  %v3427_v26 = vld [vmem:[#allocation8 + $0x74c] ss:$16 sps:$4 sm:$0xff]  }
 0x1b9   :  { %2084 = vmatprep.subr.bf16.mxu0 %v3352_v27  ;;  %2248 = vmatprep.subr.bf16.mxu1 %v3355_v4  ;;  %v3422_v27 = vld [vmem:[#allocation8 + $0x740] ss:$16 sps:$4 sm:$0xff]   ;;  %v3425_v4 = vld [vmem:[#allocation8 + $0x748] ss:$16 sps:$4 sm:$0xff]  }
 0x1bc   :  { %2085 = vmatpush1.bf16.msra.mxu0 %v3350_v31  ;;  %2249 = vmatpush1.bf16.msra.mxu1 %v3353_v32  ;;  %v3428_v31 = vld [vmem:[#allocation8 + $0x760] ss:$16 sps:$4 sm:$0xff]   ;;  %v3431_v32 = vld [vmem:[#allocation8 + $0x768] ss:$16 sps:$4 sm:$0xff]  }
 0x1bd   :  { %2086 = vmatprep.subr.bf16.mxu0 %v3358_v33  ;;  %2250 = vmatprep.subr.bf16.mxu1 %v3361_v34  ;;  %v3436_v33 = vld [vmem:[#allocation8 + $0x784] ss:$16 sps:$4 sm:$0xff]   ;;  %v3439_v34 = vld [vmem:[#allocation8 + $0x78c] ss:$16 sps:$4 sm:$0xff]  }
 0x1c0   :  { %2087 = vmatpush1.bf16.msra.mxu0 %v3356_v37  ;;  %2251 = vmatpush1.bf16.msra.mxu1 %v3359_v43  ;;  %v138_v37 = vsub.s32 6, %v3751_v38  ;;  %v3442_v43 = vld [vmem:[#allocation8 + $0x7a4] ss:$16 sps:$4 sm:$0xff]  }
 0x1c1   :  { %2097 = vmatprep.subr.bf16.mxu0 %v3364_v44  ;;  %2261 = vmatprep.subr.bf16.mxu1 %v3367_v45  ;;  %v3445_v44 = vld [vmem:[#allocation8 + $0x7ac] ss:$16 sps:$4 sm:$0xff]   ;;  %v3440_v45 = vld [vmem:[#allocation8 + $0x7a0] ss:$16 sps:$4 sm:$0xff]  }
 0x1c3   :  { %2089 = vmatmul.mubr.bf16.vlgmr.msra.gmra.mrb[8].mxu0 %v412_v46  ;;  %2253 = vmatmul.mubr.bf16.vlgmr.msra.gmra.mrb[8].mxu1 %v412_v46  ;;  %v139_v46 = vrot.slane %v3754_v40, %v138_v37  ;;  %v3458_v40 = vld [vmem:[#allocation10 + $0x40] sm:$0xff]  }
 0x1c4   :  { %2098 = vmatpush1.bf16.msra.mxu0 %v3362_v47  ;;  %2262 = vmatpush1.bf16.msra.mxu1 %v3365_v48  ;;  %v3448_v47 = vld [vmem:[#allocation8 + $0x7c4] ss:$16 sps:$4 sm:$0xff]   ;;  %v3451_v48 = vld [vmem:[#allocation8 + $0x7cc] ss:$16 sps:$4 sm:$0xff]  }
 0x1c5   :  { %2099 = vmatprep.subr.bf16.mxu0 %v3370_v49  ;;  %2263 = vmatprep.subr.bf16.mxu1 %v3373_v50  ;;  %v3446_v49 = vld [vmem:[#allocation8 + $0x7c0] ss:$16 sps:$4 sm:$0xff]   ;;  %v3449_v50 = vld [vmem:[#allocation8 + $0x7c8] ss:$16 sps:$4 sm:$0xff]  }
 0x1c6   :  { %2129 = vmatprep.mubr.bf16.mxu0 %v415_v28  ;;  %2293 = vmatprep.mubr.bf16.mxu1 %v415_v28  ;;  %v394_v28 = vadd.f32 %v3773_v25, %v139_v46  ;;  %v3462_v25 = vld [vmem:[#allocation10 + $0x48] sm:$0xff]  }
 0x1c8   :  { %2100 = vmatpush1.bf16.msra.mxu0 %v3368_v52  ;;  %2264 = vmatpush1.bf16.msra.mxu1 %v3371_v53  ;;  %v3454_v52 = vld [vmem:[#allocation8 + $0x7e4] ss:$16 sps:$4 sm:$0xff]   ;;  %v3457_v53 = vld [vmem:[#allocation8 + $0x7ec] ss:$16 sps:$4 sm:$0xff]  }
 0x1c9   :  { %2101 = vmatprep.subr.bf16.mxu0 %v3376_v54  ;;  %2265 = vmatprep.subr.bf16.mxu1 %v3379_v55  ;;  %v3452_v54 = vld [vmem:[#allocation8 + $0x7e0] ss:$16 sps:$4 sm:$0xff]   ;;  %v3455_v55 = vld [vmem:[#allocation8 + $0x7e8] ss:$16 sps:$4 sm:$0xff]  }
 0x1cc   :  { %2102 = vmatpush1.bf16.msra.mxu0 %v3374_v56  ;;  %2266 = vmatpush1.bf16.msra.mxu1 %v3377_v57  ;;  %v406_v56 = vmax.f32 %v394_v28, 0.0  ;;  %v3459_v57 = vld [vmem:[#allocation10 + $0xc0] sm:$0xff]  }
 0x1cd   :  { %2103 = vmatprep.subr.bf16.mxu0 %v3382_v58  ;;  %2267 = vmatprep.subr.bf16.mxu1 %v3385_v59  ;;  %v3460_v58 = vld [vmem:[#allocation10] sm:$0xff]  }
 0x1ce   :  { %v3461_v59 = vld [vmem:[#allocation10 + $0x80] sm:$0xff]  }
 0x1d0   :  { %2104 = vmatpush1.bf16.msra.mxu0 %v3380_v60  ;;  %2268 = vmatpush1.bf16.msra.mxu1 %v3383_v62  ;;  %v414_v60 = vpack.c.bf16 %v406_v56, %v406_v56  ;;  %v3463_v62 = vld [vmem:[#allocation10 + $0xc8] sm:$0xff]  }
 0x1d1   :  { %2105 = vmatprep.subr.bf16.mxu0 %v3388_v63  ;;  %2269 = vmatprep.subr.bf16.mxu1 %v3391_v0  ;;  %v3464_v63 = vld [vmem:[#allocation10 + $0x8] sm:$0xff]  }
 0x1d2   :  { %v3465_v0 = vld [vmem:[#allocation10 + $0x88] sm:$0xff]  }
 0x1d4   :  { %2106 = vmatpush1.bf16.msra.mxu0 %v3386_v1  ;;  %2270 = vmatpush1.bf16.msra.mxu1 %v3389_v2  ;;  %v3466_v1 = vld [vmem:[#allocation10 + $0x50] sm:$0xff]  }
 0x1d5   :  { %2107 = vmatprep.subr.bf16.mxu0 %v3394_v5  ;;  %2271 = vmatprep.subr.bf16.mxu1 %v3397_v6  ;;  %v3467_v2 = vld [vmem:[#allocation10 + $0xd0] sm:$0xff]  }
 0x1d6   :  { %v3468_v5 = vld [vmem:[#allocation10 + $0x10] sm:$0xff]  }
 0x1d7   :  { %v3469_v6 = vld [vmem:[#allocation10 + $0x90] sm:$0xff]  }
 0x1d8   :  { %2108 = vmatpush1.bf16.msra.mxu0 %v3392_v7  ;;  %2272 = vmatpush1.bf16.msra.mxu1 %v3395_v8  ;;  %v3470_v7 = vld [vmem:[#allocation10 + $0x58] sm:$0xff]  }
 0x1d9   :  { %2109 = vmatprep.subr.bf16.mxu0 %v3400_v9  ;;  %2273 = vmatprep.subr.bf16.mxu1 %v3403_v10  ;;  %v3471_v8 = vld [vmem:[#allocation10 + $0xd8] sm:$0xff]  }
 0x1da   :  { %v3472_v9 = vld [vmem:[#allocation10 + $0x18] sm:$0xff]  }
 0x1db   :  { %v3473_v10 = vld [vmem:[#allocation10 + $0x98] sm:$0xff]  }
 0x1dc   :  { %2110 = vmatpush1.bf16.msra.mxu0 %v3398_v11  ;;  %2274 = vmatpush1.bf16.msra.mxu1 %v3401_v12  ;;  %v3474_v11 = vld [vmem:[#allocation10 + $0x60] sm:$0xff]  }
 0x1dd   :  { %2111 = vmatprep.subr.bf16.mxu0 %v3406_v13  ;;  %2275 = vmatprep.subr.bf16.mxu1 %v3409_v14  ;;  %v3475_v12 = vld [vmem:[#allocation10 + $0xe0] sm:$0xff]  }
 0x1de   :  { %v3476_v13 = vld [vmem:[#allocation10 + $0x20] sm:$0xff]  }
 0x1df   :  { %v3477_v14 = vld [vmem:[#allocation10 + $0xa0] sm:$0xff]  }
 0x1e0   :  { %2112 = vmatpush1.bf16.msra.mxu0 %v3404_v15  ;;  %2276 = vmatpush1.bf16.msra.mxu1 %v3407_v16  ;;  %v3478_v15 = vld [vmem:[#allocation10 + $0x68] sm:$0xff]  }
 0x1e1   :  { %2113 = vmatprep.subr.bf16.mxu0 %v3412_v17  ;;  %2277 = vmatprep.subr.bf16.mxu1 %v3415_v18  ;;  %v3479_v16 = vld [vmem:[#allocation10 + $0xe8] sm:$0xff]  }
 0x1e2   :  { %v3480_v17 = vld [vmem:[#allocation10 + $0x28] sm:$0xff]  }
 0x1e3   :  { %v3481_v18 = vld [vmem:[#allocation10 + $0xa8] sm:$0xff]  }
 0x1e4   :  { %2114 = vmatpush1.bf16.msra.mxu0 %v3410_v19  ;;  %2278 = vmatpush1.bf16.msra.mxu1 %v3413_v20  ;;  %v3482_v19 = vld [vmem:[#allocation10 + $0x70] sm:$0xff]  }
 0x1e5   :  { %2115 = vmatprep.subr.bf16.mxu0 %v3418_v21  ;;  %2279 = vmatprep.subr.bf16.mxu1 %v3421_v51  ;;  %v3483_v20 = vld [vmem:[#allocation10 + $0xf0] sm:$0xff]  }
 0x1e6   :  { %v3484_v21 = vld [vmem:[#allocation10 + $0x30] sm:$0xff]  }
 0x1e7   :  { %v3485_v51 = vld [vmem:[#allocation10 + $0xb0] sm:$0xff]  }
 0x1e8   :  { %2116 = vmatpush1.bf16.msra.mxu0 %v3416_v22  ;;  %2280 = vmatpush1.bf16.msra.mxu1 %v3419_v23  ;;  %v3486_v22 = vld [vmem:[#allocation10 + $0x78] sm:$0xff]  }
 0x1e9   :  { %2117 = vmatprep.subr.bf16.mxu0 %v3424_v24  ;;  %2281 = vmatprep.subr.bf16.mxu1 %v3427_v26  ;;  %v3487_v23 = vld [vmem:[#allocation10 + $0xf8] sm:$0xff]  }
 0x1ea   :  { %v3488_v24 = vld [vmem:[#allocation10 + $0x38] sm:$0xff]  }
 0x1eb   :  { %v3489_v26 = vld [vmem:[#allocation10 + $0xb8] sm:$0xff]  }
 0x1ec   :  { %2118 = vmatpush1.bf16.msra.mxu0 %v3422_v27  ;;  %2282 = vmatpush1.bf16.msra.mxu1 %v3425_v4  ;;  %v672_v27 = vld [vmem:[%s3824_s4] sm:$0xf] }
 0x1ed   :  { %2119 = vmatprep.subr.bf16.mxu0 %v3430_v29  ;;  %2283 = vmatprep.subr.bf16.mxu1 %v3433_v30  ;;  %v677_v4 = vrot.slane %v672_v27, %v114_v39  ;;  %v685_v29 = vrot.slane %v672_v27, %v122_v61  ;;  %v681_v30 = vrot.slane %v672_v27, %v118_v41 }
 0x1f0   :  { %2120 = vmatpush1.bf16.msra.mxu0 %v3428_v31  ;;  %2284 = vmatpush1.bf16.msra.mxu1 %v3431_v32  ;;  %v689_v31 = vrot.slane %v672_v27, %v126_v42 }
 0x1f1   :  { %2121 = vmatprep.subr.bf16.mxu0 %v3436_v33  ;;  %2285 = vmatprep.subr.bf16.mxu1 %v3439_v34 }
 0x1f4   :  { %2122 = vmatpush1.bf16.msra.mxu0 %v3434_v35  ;;  %2286 = vmatpush1.bf16.msra.mxu1 %v3437_v36 }
 0x1f5   :  { %2123 = vmatprep.subr.bf16.mxu0 %v3442_v43  ;;  %2287 = vmatprep.subr.bf16.mxu1 %v3445_v44 }
 0x1f8   :  { %2124 = vmatpush1.bf16.msra.mxu0 %v3440_v45  ;;  %2288 = vmatpush1.bf16.msra.mxu1 %v3443_v3 }
 0x1f9   :  { %2125 = vmatprep.subr.bf16.mxu0 %v3448_v47  ;;  %2289 = vmatprep.subr.bf16.mxu1 %v3451_v48 }
 0x1fc   :  { %2126 = vmatpush1.bf16.msra.mxu0 %v3446_v49  ;;  %2290 = vmatpush1.bf16.msra.mxu1 %v3449_v50 }
 0x1fd   :  { %2127 = vmatprep.subr.bf16.mxu0 %v3454_v52  ;;  %2291 = vmatprep.subr.bf16.mxu1 %v3457_v53  ;;  %v2956_v53 = vld [vmem:[%s3826_s6] ss:$0 sm:$0xff]  ;;  %s3646_s6 = smov [#allocation11]  }
 0x1fe   :  { %s2669_s17 = sshll.u32 %s3646_s6, 4  ;;  %s2670_s17 = int_to_ptr.vmem [resolvable:$true] %s2669_s17 }
 0x1ff   :  { %s3604_s18 = scalar_lea.vmem %s2670_s17, 128  ;;  %p3609_p13 = scmp.lt.s32.totalorder %s2670_s17, %s2670_s17 }
 0x200   :  { %2128 = vmatpush1.bf16.msra.mxu0 %v3452_v54  ;;  %2292 = vmatpush1.bf16.msra.mxu1 %v3455_v55  ;;  %p3605_p12 = scmp.ne.s32.totalorder %s2670_s17, %s3604_s18  ;;  %p3610_p0 = scmp.lt.s32.totalorder %s3604_s18, %s3604_s18 }
 0x201   :  { %2989 = vmatprep.subr.bf16.mxu0 %v3458_v40  ;;  %3011 = vmatprep.subr.bf16.mxu1 %v3459_v57 }
 0x202   :  { %p3611_p1 = por %p3610_p0, %p3609_p13 }
 0x203   :  { %2130 = vmatmul.mubr.bf16.vlgmr.msra.gmra.mrb[8].mxu0 %v414_v60  ;;  %2294 = vmatmul.mubr.bf16.vlgmr.msra.gmra.mrb[8].mxu1 %v414_v60 }
 0x204   :  { %2990 = vmatpush3.bf16.msra.mxu0 %v3460_v58  ;;  %3012 = vmatpush3.bf16.msra.mxu1 %v3461_v59  ;;  %p3612_p2 = pnand %p3611_p1, %p3605_p12 }
 0x205   :  { %2991 = vmatprep.subr.bf16.mxu0 %v3462_v25  ;;  %3013 = vmatprep.subr.bf16.mxu1 %v3463_v62 }
 0x208   :  { %2992 = vmatpush3.bf16.msra.mxu0 %v3464_v63  ;;  %3014 = vmatpush3.bf16.msra.mxu1 %v3465_v0 }
 0x209   :  { %2993 = vmatprep.subr.bf16.mxu0 %v3466_v1  ;;  %3015 = vmatprep.subr.bf16.mxu1 %v3467_v2 }
 0x20c   :  { %2994 = vmatpush3.bf16.msra.mxu0 %v3468_v5  ;;  %3016 = vmatpush3.bf16.msra.mxu1 %v3469_v6 }
 0x20d   :  { %2995 = vmatprep.subr.bf16.mxu0 %v3470_v7  ;;  %3017 = vmatprep.subr.bf16.mxu1 %v3471_v8 }
 0x210   :  { %2996 = vmatpush3.bf16.msra.mxu0 %v3472_v9  ;;  %3018 = vmatpush3.bf16.msra.mxu1 %v3473_v10 }
 0x211   :  { %2997 = vmatprep.subr.bf16.mxu0 %v3474_v11  ;;  %3019 = vmatprep.subr.bf16.mxu1 %v3475_v12 }
 0x214   :  { %2998 = vmatpush3.bf16.msra.mxu0 %v3476_v13  ;;  %3020 = vmatpush3.bf16.msra.mxu1 %v3477_v14 }
 0x215   :  { %2999 = vmatprep.subr.bf16.mxu0 %v3478_v15  ;;  %3021 = vmatprep.subr.bf16.mxu1 %v3479_v16 }
 0x218   :  { %3000 = vmatpush3.bf16.msra.mxu0 %v3480_v17  ;;  %3022 = vmatpush3.bf16.msra.mxu1 %v3481_v18 }
 0x219   :  { %3001 = vmatprep.subr.bf16.mxu0 %v3482_v19  ;;  %3023 = vmatprep.subr.bf16.mxu1 %v3483_v20 }
 0x21c   :  { %3002 = vmatpush3.bf16.msra.mxu0 %v3484_v21  ;;  %3024 = vmatpush3.bf16.msra.mxu1 %v3485_v51 }
 0x21d   :  { %3003 = vmatprep.subr.bf16.mxu0 %v3486_v22  ;;  %3025 = vmatprep.subr.bf16.mxu1 %v3487_v23 }
 0x220   :  { %3004 = vmatpush3.bf16.msra.mxu0 %v3488_v24  ;;  %3026 = vmatpush3.bf16.msra.mxu1 %v3489_v26 }
 0x2d6   :  { %v2131_v32 = vpop.f32.mrb[8].mxu0  ;;  %v2295_v33 = vpop.f32.mrb[8].mxu1 }
 0x2d7   :  { %v3033_v34 = vadd.f32 %v2131_v32, %v677_v4  ;;  %v3035_v35 = vadd.f32 %v2295_v33, %v685_v29  ;;  %v2133_v36 = vpop.f32.mrb[9].mxu0  ;;  %v2297_v37 = vpop.f32.mrb[9].mxu1 }
 0x2d8   :  { %v3034_v43 = vadd.f32 %v2133_v36, %v681_v30  ;;  %v3036_v44 = vadd.f32 %v2297_v37, %v689_v31  ;;  %v2135_v45 = vpop.f32.mrb[10].mxu0  ;;  %v2299_v3 = vpop.f32.mrb[10].mxu1 }
 0x2d9   :  { %v2302_v39 = vmax.f32 %v3033_v34, 0.0  ;;  %v2304_v46 = vmax.f32 %v3035_v35, 0.0  ;;  %v2136_v47 = vpop.f32.mrb[11].mxu0  ;;  %v2300_v61 = vpop.f32.mrb[11].mxu1 }
 0x2da   :  { %v2303_v48 = vmax.f32 %v3034_v43, 0.0  ;;  %v2305_v49 = vmax.f32 %v3036_v44, 0.0 }
 0x2db   :  { %v2306_v38 = vpack.c.bf16 %v2302_v39, %v2302_v39  ;;  %v2308_v42 = vpack.c.bf16 %v2304_v46, %v2304_v46 }
 0x2dc   :  { %v2307_v41 = vpack.c.bf16 %v2303_v48, %v2303_v48  ;;  %v2309_v50 = vpack.c.bf16 %v2305_v49, %v2305_v49 }
 0x2de   :  { %2605 = vmatprep.mubr.bf16.mxu0 %v2307_v41  ;;  %2645 = vmatprep.mubr.bf16.mxu1 %v2309_v50 }
 0x2df   :  { %2606 = vmatmul.mubr.bf16.vlgmr.msra.gmra.mrb[12].mxu0 %v2306_v38  ;;  %2646 = vmatmul.mubr.bf16.vlgmr.msra.gmra.mrb[12].mxu1 %v2308_v42 }
 0x3b2   :  { %v3005_v28 = vpop.f32.mrb[12].mxu0  ;;  %v3027_v52 = vpop.f32.mrb[12].mxu1 }
 0x3b3   :  { %v3006_v54 = vpop.f32.mrb[13].mxu0  ;;  %v3028_v55 = vpop.f32.mrb[13].mxu1 }
 0x3b4   :  { %v3007_v56 = vadd.f32 %v3006_v54, %v3005_v28  ;;  %v3029_v40 = vadd.f32 %v3028_v55, %v3027_v52  ;;  %v3008_v57 = vpop.f32.mrb[14].mxu0  ;;  %v3030_v58 = vpop.f32.mrb[14].mxu1 }
 0x3b5   :  { %v3009_v59 = vpop.f32.mrb[15].mxu0  ;;  %v3031_v60 = vpop.f32.mrb[15].mxu1 }
 0x3b6   :  { %v2608_v25 = vadd.f32 %v3007_v56, %v2956_v53 }
 0x3b8   :  { %v2648_v62 = vadd.f32 %v3029_v40, %v2608_v25 }
 0x3ba   :  { %2653 = vmax.xlane.f32.xlu0 %v2648_v62 }
 0x447   :  { %v2654_v63 = vpop.xlane.xlu0 %2653 }
 0x448   :  { %v2655_v0 = vsub.f32 %v2648_v62, %v2654_v63 }
 0x44a   :  { %v2656_v1 = vmul.f32 1.442695, %v2655_v0 }
 0x44c   :  { %3490 = vpow2.f32 %v2656_v1 }
 0x456   :  { %v3491_v2 = vpop.eup %3490 }
 0x457   :  { %2658 = vadd.xlane.f32.xlu0 %v3491_v2 }
 0x4e4   :  { %v2659_v5 = vpop.xlane.xlu0 %2658 }
 0x4e5   :  { %3492 = vrcp.f32 %v2659_v5 }
 0x4ef   :  { %v3493_v6 = vpop.eup %3492 }
 0x4f0   :  { %v2661_v7 = vmul.f32 %v3493_v6, %v3491_v2 }
 0x4f2   :  { %2662 = vst [vmem:[#allocation11] sm:$0xff] %v2661_v7 }
 0x4f3   :  { %3615 = shalt.err (!%p3612_p2)
}
 0x4f4   :  { %s3616_s21 = scalar_lea.hbm %s3827_s7, 128 }
 0x4f5   :  { %p3617_p3 = scmp.ne.s32.totalorder %s3827_s7, %s3616_s21  ;;  %p3620_p4 = scmp.lt.u32.totalorder %s3616_s21, %s3827_s7 }
 0x4f7   :  { %p3622_p5 = pnand %p3620_p4, %p3617_p3 }
 0x4f9   :  { %3625 = shalt.err (!%p3622_p5)
}
 0x4fa   :  { %2672 = dma.vmem_to_hbm [thread:$0]  %s2670_s17, 128, %s3827_s7, [#allocation4]  }
 0x4fb   :  { %3632 = dma.done.wait [#allocation4], 128  }
 0x4fc   :  { %3633 = vsyncadd [#allocation4], 4294967168 }
 0x4fd   :  { %2676 = vsyncpa [#allocation3], 1 }
 0x4fe   :  { %2677 = vsyncpa [#allocation6], 1 }
 0x4ff   :  { %2678 = vsyncpa [#allocation9], 1 }
 0x500   :  { %2679 = vsyncpa [#allocation4], 1 }

</bundles_post_ra>
